<compile_context>
chip_gen: v7x
topology: tpu7x:2x2x1
jax: 0.10.0
libtpu: 0.0.40
codegen_flags: <defaults>
</compile_context>

<pallas_src>
import functools

import jax
import jax.numpy as jnp
from jax.experimental import pallas as pl
from jax.experimental.pallas import tpu as pltpu

_VMEM_LIMIT = 32 * 1024 * 1024  # safe on v5e / v6e / v7x


# ----------------------------------------------------------------------------
# Pallas kernels
# ----------------------------------------------------------------------------
def _gemm_bias_act_kernel(x_ref, w_ref, b_ref, o_ref, *, act):
    """o = act(x @ w + b); bf16 operands, f32 accumulate."""
    acc = jnp.dot(x_ref[...], w_ref[...], preferred_element_type=jnp.float32)
    acc = acc + b_ref[...]                       # (1, N) broadcasts over rows
    if act == "relu":
        acc = jnp.maximum(acc, 0.0)
    elif act == "sigmoid":
        acc = jax.nn.sigmoid(acc)
    o_ref[...] = acc.astype(o_ref.dtype)


def pallas_matmul(x, w, b, act="none", out_dtype=jnp.bfloat16, tile_m=256):
    """x: (M, K), w: (K, N) bf16, b: (N,) f32 -> (M, N) out_dtype."""
    M, K = x.shape
    K2, N = w.shape
    assert K == K2
    if x.dtype != jnp.bfloat16:
        x = x.astype(jnp.bfloat16)
    if w.dtype != jnp.bfloat16:
        w = w.astype(jnp.bfloat16)
    b2 = b.reshape(1, N).astype(jnp.float32)

    # Tile M so the grid can be split across TensorCores (v7x megacore) and
    # per-block VMEM stays small; fall back to a single whole-M block.
    tm = tile_m if (M > tile_m and M % tile_m == 0) else M
    grid = (M // tm,)
    kernel = functools.partial(_gemm_bias_act_kernel, act=act)
    return pl.pallas_call(
        kernel,
        out_shape=jax.ShapeDtypeStruct((M, N), out_dtype),
        grid=grid,
        in_specs=[
            pl.BlockSpec((tm, K), lambda i: (i, 0)),
            pl.BlockSpec((K, N), lambda i: (0, 0)),
            pl.BlockSpec((1, N), lambda i: (0, 0)),
        ],
        out_specs=pl.BlockSpec((tm, N), lambda i: (i, 0)),
        compiler_params=pltpu.CompilerParams(
            dimension_semantics=("parallel",),
            vmem_limit_bytes=_VMEM_LIMIT),
    )(x, w, b2)


def _head_kernel(hf_ref, wml_ref, bml_ref, eps_ref, wtop_ref, embb_ref,
                 mean_ref, logvar_ref, d_ref):
    """Fused: [mean|logvar] GEMM -> reparameterize -> decoder FC (+emb) + ReLU."""
    L = eps_ref.shape[1]
    ml = jnp.dot(hf_ref[...], wml_ref[...], preferred_element_type=jnp.float32)
    ml = ml + bml_ref[...]
    mean = ml[:, :L]
    logvar = ml[:, L:]
    # exp lowers to the EUP slot -> effectively free next to the MXU work.
    sample = mean + eps_ref[...] * jnp.exp(0.5 * logvar)
    d = jnp.dot(sample.astype(wtop_ref.dtype), wtop_ref[...],
                preferred_element_type=jnp.float32)
    d = jnp.maximum(d + embb_ref[...], 0.0)
    mean_ref[...] = mean
    logvar_ref[...] = logvar
    d_ref[...] = d.astype(d_ref.dtype)


def pallas_vae_head(hf, w_ml, b_ml, eps, w_top, emb_b):
    """Returns (mean, logvar, decoder_fc_activation)."""
    B, F = hf.shape
    L = eps.shape[1]

    def full(shape):
        return pl.BlockSpec(shape, lambda i: (0, 0))

    return pl.pallas_call(
        _head_kernel,
        out_shape=(jax.ShapeDtypeStruct((B, L), jnp.float32),
                   jax.ShapeDtypeStruct((B, L), jnp.float32),
                   jax.ShapeDtypeStruct((B, F), jnp.bfloat16)),
        grid=(1,),
        in_specs=[full((B, F)), full((F, 2 * L)), full((1, 2 * L)),
                  full((B, L)), full((L, F)), full((B, F))],
        out_specs=(full((B, L)), full((B, L)), full((B, F))),
        compiler_params=pltpu.CompilerParams(
            dimension_semantics=("arbitrary",),
            vmem_limit_bytes=_VMEM_LIMIT),
    )(hf.astype(jnp.bfloat16), w_ml, b_ml.reshape(1, 2 * L).astype(jnp.float32),
      eps, w_top, emb_b.astype(jnp.float32))


# ----------------------------------------------------------------------------
# Plain-JAX glue (NHWC, transpose-free): im2col + conv / conv-transpose
# ----------------------------------------------------------------------------
def _im2col_nhwc(x, k, stride, pad):
    """x: (B, H, W, C) -> (B*Ho*Wo, k*k*C); pad = (top, bottom, left, right)."""
    B, H, W, C = x.shape
    pt, pb, pleft, pright = pad
    xp = jnp.pad(x, ((0, 0), (pt, pb), (pleft, pright), (0, 0)))
    Hp, Wp = H + pt + pb, W + pleft + pright
    Ho = (Hp - k) // stride + 1
    Wo = (Wp - k) // stride + 1
    patches = []
    for i in range(k):
        for j in range(k):
            patches.append(
                xp[:, i:i + stride * Ho:stride, j:j + stride * Wo:stride, :])
    col = jnp.concatenate(patches, axis=-1)          # (B, Ho, Wo, k*k*C)
    return col.reshape(B * Ho * Wo, k * k * C), Ho, Wo


def conv2d_nhwc(x, wmat, b, stride=1, pad=(1, 1, 1, 1), act="none",
                out_dtype=jnp.bfloat16, k=3):
    """wmat: pre-reshaped (k*k*C_in, C_out) bf16.  x NHWC -> NHWC."""
    B = x.shape[0]
    col, Ho, Wo = _im2col_nhwc(x, k, stride, pad)
    out = pallas_matmul(col, wmat, b, act=act, out_dtype=out_dtype)
    return out.reshape(B, Ho, Wo, wmat.shape[1])      # contiguous, no transpose


def conv_transpose2d_nhwc(x, wmat, b, stride=2, padding=1, output_padding=1,
                          act="none", k=3):
    """wmat pre-flipped/channel-swapped at init.  x NHWC -> NHWC."""
    # TODO(synk): subpixel (phase) decomposition would avoid the 75%-zero
    # dilated GEMM, but at these shapes the extra kernel launches cost more.
    B, H, W, C = x.shape
    xd = jnp.zeros((B, (H - 1) * stride + 1, (W - 1) * stride + 1, C), x.dtype)
    xd = xd.at[:, ::stride, ::stride, :].set(x)
    pad_lo = k - 1 - padding
    pad_hi = k - 1 - padding + output_padding
    return conv2d_nhwc(xd, wmat, b, stride=1,
                       pad=(pad_lo, pad_hi, pad_lo, pad_hi), act=act, k=k)


# ----------------------------------------------------------------------------
# VAE parameters (pre-laid-out for the kernels) + forward
# ----------------------------------------------------------------------------
def init_params(key, in_channels, height, width, mid_channels, latent_dim,
                num_classes):
    n_down = len(mid_channels) - 1
    mid_h = height // (2 ** n_down)
    mid_w = width // (2 ** n_down)
    mid_c = mid_channels[-1]
    mid_flat = mid_c * mid_h * mid_w

    keys = iter(jax.random.split(key, 16))

    def randn(shape, fan_in):
        return jax.random.normal(next(keys), shape, jnp.float32) / jnp.sqrt(fan_in)

    def conv_wmat(w):
        # PyTorch Conv2d (Cout, Cin, k, k) -> GEMM weight (k*k*Cin, Cout) bf16.
        Cout, Cin, kh, kw = w.shape
        return (w.transpose(2, 3, 1, 0)
                .reshape(kh * kw * Cin, Cout).astype(jnp.bfloat16))

    def convt_wmat(w):
        # PyTorch ConvTranspose2d (Cin, Cout, k, k): flip spatially + swap
        # channel roles, already laid out as GEMM weight (k*k*Cin, Cout) bf16.
        Cin, Cout, kh, kw = w.shape
        return (jnp.flip(w, axis=(2, 3)).transpose(2, 3, 0, 1)
                .reshape(kh * kw * Cin, Cout).astype(jnp.bfloat16))

    p = {}
    # encoder: Conv(s1)+ReLU, Conv(s2)+ReLU, Conv(s2)+ReLU
    p["enc0_wm"] = conv_wmat(randn((mid_channels[0], in_channels, 3, 3),
                                   in_channels * 9))
    p["enc0_b"] = jnp.zeros((mid_channels[0],), jnp.float32)
    p["enc1_wm"] = conv_wmat(randn((mid_channels[1], mid_channels[0], 3, 3),
                                   mid_channels[0] * 9))
    p["enc1_b"] = jnp.zeros((mid_channels[1],), jnp.float32)
    p["enc2_wm"] = conv_wmat(randn((mid_channels[2], mid_channels[1], 3, 3),
                                   mid_channels[1] * 9))
    p["enc2_b"] = jnp.zeros((mid_channels[2],), jnp.float32)

    # mean / logvar heads fused along N: columns [0:L] = mean, [L:2L] = logvar.
    mean_w = randn((mid_flat, latent_dim), mid_flat)
    logvar_w = randn((mid_flat, latent_dim), mid_flat)
    p["ml_w"] = jnp.concatenate([mean_w, logvar_w], axis=1).astype(jnp.bfloat16)
    p["ml_b"] = jnp.zeros((2 * latent_dim,), jnp.float32)

    # decoder FC on z = concat(sample, class_emb[label]):
    #   z @ W + b == sample @ W_top + (class_emb @ W_bot)[label] + b
    # -> fold the embedding half into a per-class additive table at init.
    class_emb = jax.random.normal(next(keys), (num_classes, latent_dim),
                                  jnp.float32)
    dec_fc_w = randn((2 * latent_dim, mid_flat), 2 * latent_dim)
    p["dec_w_top"] = dec_fc_w[:latent_dim].astype(jnp.bfloat16)
    p["dec_emb_table"] = class_emb @ dec_fc_w[latent_dim:]   # (num_classes, mid_flat)
    p["dec_fc_b"] = jnp.zeros((mid_flat,), jnp.float32)

    # decoder: ConvT(s2)+ReLU, ConvT(s2)+ReLU, Conv(s1)+Sigmoid
    p["dec0_wm"] = convt_wmat(randn((mid_channels[2], mid_channels[1], 3, 3),
                                    mid_channels[2] * 9))
    p["dec0_b"] = jnp.zeros((mid_channels[1],), jnp.float32)
    p["dec1_wm"] = convt_wmat(randn((mid_channels[1], mid_channels[0], 3, 3),
                                    mid_channels[1] * 9))
    p["dec1_b"] = jnp.zeros((mid_channels[0],), jnp.float32)
    p["dec2_wm"] = conv_wmat(randn((in_channels, mid_channels[0], 3, 3),
                                   mid_channels[0] * 9))
    p["dec2_b"] = jnp.zeros((in_channels,), jnp.float32)

    meta = dict(mid_c=mid_c, mid_h=mid_h, mid_w=mid_w, latent_dim=latent_dim)
    return p, meta


def vae_forward(params, meta, x, label, noise_key):
    """x: (B, C, H, W) f32 NCHW; label: (B,) int32 -> (out, mean, logvar)."""
    B = x.shape[0]
    # single NCHW -> NHWC conversion, cast once to bf16 for all conv GEMMs
    h = jnp.transpose(x, (0, 2, 3, 1)).astype(jnp.bfloat16)

    # ---- encoder ----
    h = conv2d_nhwc(h, params["enc0_wm"], params["enc0_b"], stride=1, act="relu")
    h = conv2d_nhwc(h, params["enc1_wm"], params["enc1_b"], stride=2, act="relu")
    h = conv2d_nhwc(h, params["enc2_wm"], params["enc2_b"], stride=2, act="relu")
    hf = h.reshape(B, -1)                               # NHWC flatten (see note)

    # ---- fused mean/logvar + reparameterize + class-emb + decoder FC ----
    eps = jax.random.normal(noise_key, (B, meta["latent_dim"]), jnp.float32)
    emb_b = params["dec_emb_table"][label] + params["dec_fc_b"][None, :]
    mean, logvar, d = pallas_vae_head(hf, params["ml_w"], params["ml_b"],
                                      eps, params["dec_w_top"], emb_b)

    # ---- decoder convs ----
    d = d.reshape(B, meta["mid_h"], meta["mid_w"], meta["mid_c"])
    d = conv_transpose2d_nhwc(d, params["dec0_wm"], params["dec0_b"], act="relu")
    d = conv_transpose2d_nhwc(d, params["dec1_wm"], params["dec1_b"], act="relu")
    out = conv2d_nhwc(d, params["dec2_wm"], params["dec2_b"], stride=1,
                      act="sigmoid", out_dtype=jnp.float32)
    out = jnp.transpose(out, (0, 3, 1, 2))              # NHWC -> NCHW once
    return out, mean, logvar


# ----------------------------------------------------------------------------
if __name__ == "__main__":
    B = 2
    in_channels = 4
    height = width = 16
    mid_channels = [8, 8, 8]
    latent_dim = 16
    num_classes = 10

    root = jax.random.PRNGKey(0)
    k_param, k_x, k_label, k_noise = jax.random.split(root, 4)

    params, meta = init_params(k_param, in_channels, height, width,
                               mid_channels, latent_dim, num_classes)

    x = jax.random.uniform(k_x, (B, in_channels, height, width), jnp.float32)
    label = jax.random.randint(k_label, (B,), 0, num_classes, jnp.int32)

    fwd = jax.jit(functools.partial(vae_forward, params, meta))
    out, mean, logvar = fwd(x, label, k_noise)
    jax.block_until_ready((out, mean, logvar))

    assert out.shape == (B, in_channels, height, width)
    assert mean.shape == (B, latent_dim)
    assert logvar.shape == (B, latent_dim)
    assert bool(jnp.all(jnp.isfinite(out)))
    assert bool(jnp.all((out >= 0.0) & (out <= 1.0)))   # sigmoid output range

    print("KERNEL_OK")
</pallas_src>

<mosaic_0001>
module attributes {stable_mosaic.version = 11 : i64} {
  func.func @_gemm_bias_act_kernel(%arg0: i32, %arg1: memref<256x36xbf16, #tpu.memory_space<vmem>>, %arg2: memref<36x8xbf16, #tpu.memory_space<vmem>>, %arg3: memref<1x8xf32, #tpu.memory_space<vmem>>, %arg4: memref<256x8xbf16, #tpu.memory_space<vmem>>) attributes {dimension_semantics = [#tpu.dimension_semantics<parallel>], iteration_bounds = array<i64: 2>, scalar_prefetch = 0 : i64, scratch_operands = 0 : i64, tpu.core_type = #tpu.core_type<tc>, window_params = [{transform_indices = @transform_0, window_bounds = array<i64: 256, 36>}, {pipeline_mode = #tpu.pipeline_mode<synchronous>, transform_indices = @transform_1, window_bounds = array<i64: 36, 8>}, {pipeline_mode = #tpu.pipeline_mode<synchronous>, transform_indices = @transform_2, window_bounds = array<i64: 1, 8>}, {transform_indices = @transform_3, window_bounds = array<i64: 256, 8>}]} {
    %c0 = arith.constant 0 : index
    %c0_0 = arith.constant 0 : index
    %0 = vector.load %arg1[%c0, %c0_0] : memref<256x36xbf16, #tpu.memory_space<vmem>>, vector<256x36xbf16>
    %c0_1 = arith.constant 0 : index
    %c0_2 = arith.constant 0 : index
    %1 = vector.load %arg2[%c0_1, %c0_2] : memref<36x8xbf16, #tpu.memory_space<vmem>>, vector<36x8xbf16>
    %cst = arith.constant dense<0.000000e+00> : vector<256x8xf32>
    %2 = tpu.matmul %0, %1, %cst {dimension_numbers = #tpu.dot_dimension_numbers<[1], [0], [0], [1], [0, 0, 1, 1], [], []>} : vector<256x36xbf16>, vector<36x8xbf16>, vector<256x8xf32> -> vector<256x8xf32>
    %c0_3 = arith.constant 0 : index
    %c0_4 = arith.constant 0 : index
    %3 = vector.load %arg3[%c0_3, %c0_4] : memref<1x8xf32, #tpu.memory_space<vmem>>, vector<1x8xf32>
    %4 = vector.broadcast %3 : vector<1x8xf32> to vector<256x8xf32>
    %5 = arith.addf %2, %4 : vector<256x8xf32>
    %cst_5 = arith.constant 0.000000e+00 : f32
    %6 = vector.broadcast %cst_5 : f32 to vector<256x8xf32>
    %7 = arith.maximumf %5, %6 : vector<256x8xf32>
    %8 = arith.truncf %7 : vector<256x8xf32> to vector<256x8xbf16>
    %c0_6 = arith.constant 0 : index
    %c0_7 = arith.constant 0 : index
    %9 = vector.load %arg4[%c0_6, %c0_7] : memref<256x8xbf16, #tpu.memory_space<vmem>>, vector<256x8xbf16>
    tpu.vector_store %arg4[%c0_6, %c0_7], %8 {strides = array<i32>} : memref<256x8xbf16, #tpu.memory_space<vmem>>, vector<256x8xbf16>,
    return
  }
  func.func @transform_0(%arg0: i32) -> (i32, i32) {
    %c0_i32 = arith.constant 0 : i32
    %c0_i32_0 = arith.constant 0 : i32
    return %arg0, %c0_i32 : i32, i32
  }
  func.func @transform_1(%arg0: i32) -> (i32, i32) {
    %c0_i32 = arith.constant 0 : i32
    %c0_i32_0 = arith.constant 0 : i32
    %c0_i32_1 = arith.constant 0 : i32
    return %c0_i32, %c0_i32_0 : i32, i32
  }
  func.func @transform_2(%arg0: i32) -> (i32, i32) {
    %c0_i32 = arith.constant 0 : i32
    %c0_i32_0 = arith.constant 0 : i32
    %c0_i32_1 = arith.constant 0 : i32
    return %c0_i32, %c0_i32_0 : i32, i32
  }
  func.func @transform_3(%arg0: i32) -> (i32, i32) {
    %c0_i32 = arith.constant 0 : i32
    %c0_i32_0 = arith.constant 0 : i32
    return %arg0, %c0_i32 : i32, i32
  }
}

module attributes {stable_mosaic.version = 11 : i64} {
  func.func @_gemm_bias_act_kernel(%arg0: i32, %arg1: memref<128x72xbf16, #tpu.memory_space<vmem>>, %arg2: memref<72x8xbf16, #tpu.memory_space<vmem>>, %arg3: memref<1x8xf32, #tpu.memory_space<vmem>>, %arg4: memref<128x8xbf16, #tpu.memory_space<vmem>>) attributes {dimension_semantics = [#tpu.dimension_semantics<parallel>], iteration_bounds = array<i64: 1>, scalar_prefetch = 0 : i64, scratch_operands = 0 : i64, tpu.core_type = #tpu.core_type<tc>, window_params = [{transform_indices = @transform_0, window_bounds = array<i64: 128, 72>}, {pipeline_mode = #tpu.pipeline_mode<synchronous>, transform_indices = @transform_1, window_bounds = array<i64: 72, 8>}, {pipeline_mode = #tpu.pipeline_mode<synchronous>, transform_indices = @transform_2, window_bounds = array<i64: 1, 8>}, {transform_indices = @transform_3, window_bounds = array<i64: 128, 8>}]} {
    %c0 = arith.constant 0 : index
    %c0_0 = arith.constant 0 : index
    %0 = vector.load %arg1[%c0, %c0_0] : memref<128x72xbf16, #tpu.memory_space<vmem>>, vector<128x72xbf16>
    %c0_1 = arith.constant 0 : index
    %c0_2 = arith.constant 0 : index
    %1 = vector.load %arg2[%c0_1, %c0_2] : memref<72x8xbf16, #tpu.memory_space<vmem>>, vector<72x8xbf16>
    %cst = arith.constant dense<0.000000e+00> : vector<128x8xf32>
    %2 = tpu.matmul %0, %1, %cst {dimension_numbers = #tpu.dot_dimension_numbers<[1], [0], [0], [1], [0, 0, 1, 1], [], []>} : vector<128x72xbf16>, vector<72x8xbf16>, vector<128x8xf32> -> vector<128x8xf32>
    %c0_3 = arith.constant 0 : index
    %c0_4 = arith.constant 0 : index
    %3 = vector.load %arg3[%c0_3, %c0_4] : memref<1x8xf32, #tpu.memory_space<vmem>>, vector<1x8xf32>
    %4 = vector.broadcast %3 : vector<1x8xf32> to vector<128x8xf32>
    %5 = arith.addf %2, %4 : vector<128x8xf32>
    %cst_5 = arith.constant 0.000000e+00 : f32
    %6 = vector.broadcast %cst_5 : f32 to vector<128x8xf32>
    %7 = arith.maximumf %5, %6 : vector<128x8xf32>
    %8 = arith.truncf %7 : vector<128x8xf32> to vector<128x8xbf16>
    %c0_6 = arith.constant 0 : index
    %c0_7 = arith.constant 0 : index
    %9 = vector.load %arg4[%c0_6, %c0_7] : memref<128x8xbf16, #tpu.memory_space<vmem>>, vector<128x8xbf16>
    tpu.vector_store %arg4[%c0_6, %c0_7], %8 {strides = array<i32>} : memref<128x8xbf16, #tpu.memory_space<vmem>>, vector<128x8xbf16>,
    return
  }
  func.func @transform_0(%arg0: i32) -> (i32, i32) {
    %c0_i32 = arith.constant 0 : i32
    %c0_i32_0 = arith.constant 0 : i32
    return %arg0, %c0_i32 : i32, i32
  }
  func.func @transform_1(%arg0: i32) -> (i32, i32) {
    %c0_i32 = arith.constant 0 : i32
    %c0_i32_0 = arith.constant 0 : i32
    %c0_i32_1 = arith.constant 0 : i32
    return %c0_i32, %c0_i32_0 : i32, i32
  }
  func.func @transform_2(%arg0: i32) -> (i32, i32) {
    %c0_i32 = arith.constant 0 : i32
    %c0_i32_0 = arith.constant 0 : i32
    %c0_i32_1 = arith.constant 0 : i32
    return %c0_i32, %c0_i32_0 : i32, i32
  }
  func.func @transform_3(%arg0: i32) -> (i32, i32) {
    %c0_i32 = arith.constant 0 : i32
    %c0_i32_0 = arith.constant 0 : i32
    return %arg0, %c0_i32 : i32, i32
  }
}

module attributes {stable_mosaic.version = 11 : i64} {
  func.func @_gemm_bias_act_kernel(%arg0: i32, %arg1: memref<32x72xbf16, #tpu.memory_space<vmem>>, %arg2: memref<72x8xbf16, #tpu.memory_space<vmem>>, %arg3: memref<1x8xf32, #tpu.memory_space<vmem>>, %arg4: memref<32x8xbf16, #tpu.memory_space<vmem>>) attributes {dimension_semantics = [#tpu.dimension_semantics<parallel>], iteration_bounds = array<i64: 1>, scalar_prefetch = 0 : i64, scratch_operands = 0 : i64, tpu.core_type = #tpu.core_type<tc>, window_params = [{transform_indices = @transform_0, window_bounds = array<i64: 32, 72>}, {pipeline_mode = #tpu.pipeline_mode<synchronous>, transform_indices = @transform_1, window_bounds = array<i64: 72, 8>}, {pipeline_mode = #tpu.pipeline_mode<synchronous>, transform_indices = @transform_2, window_bounds = array<i64: 1, 8>}, {transform_indices = @transform_3, window_bounds = array<i64: 32, 8>}]} {
    %c0 = arith.constant 0 : index
    %c0_0 = arith.constant 0 : index
    %0 = vector.load %arg1[%c0, %c0_0] : memref<32x72xbf16, #tpu.memory_space<vmem>>, vector<32x72xbf16>
    %c0_1 = arith.constant 0 : index
    %c0_2 = arith.constant 0 : index
    %1 = vector.load %arg2[%c0_1, %c0_2] : memref<72x8xbf16, #tpu.memory_space<vmem>>, vector<72x8xbf16>
    %cst = arith.constant dense<0.000000e+00> : vector<32x8xf32>
    %2 = tpu.matmul %0, %1, %cst {dimension_numbers = #tpu.dot_dimension_numbers<[1], [0], [0], [1], [0, 0, 1, 1], [], []>} : vector<32x72xbf16>, vector<72x8xbf16>, vector<32x8xf32> -> vector<32x8xf32>
    %c0_3 = arith.constant 0 : index
    %c0_4 = arith.constant 0 : index
    %3 = vector.load %arg3[%c0_3, %c0_4] : memref<1x8xf32, #tpu.memory_space<vmem>>, vector<1x8xf32>
    %4 = vector.broadcast %3 : vector<1x8xf32> to vector<32x8xf32>
    %5 = arith.addf %2, %4 : vector<32x8xf32>
    %cst_5 = arith.constant 0.000000e+00 : f32
    %6 = vector.broadcast %cst_5 : f32 to vector<32x8xf32>
    %7 = arith.maximumf %5, %6 : vector<32x8xf32>
    %8 = arith.truncf %7 : vector<32x8xf32> to vector<32x8xbf16>
    %c0_6 = arith.constant 0 : index
    %c0_7 = arith.constant 0 : index
    %9 = vector.load %arg4[%c0_6, %c0_7] : memref<32x8xbf16, #tpu.memory_space<vmem>>, vector<32x8xbf16>
    tpu.vector_store %arg4[%c0_6, %c0_7], %8 {strides = array<i32>} : memref<32x8xbf16, #tpu.memory_space<vmem>>, vector<32x8xbf16>,
    return
  }
  func.func @transform_0(%arg0: i32) -> (i32, i32) {
    %c0_i32 = arith.constant 0 : i32
    %c0_i32_0 = arith.constant 0 : i32
    return %arg0, %c0_i32 : i32, i32
  }
  func.func @transform_1(%arg0: i32) -> (i32, i32) {
    %c0_i32 = arith.constant 0 : i32
    %c0_i32_0 = arith.constant 0 : i32
    %c0_i32_1 = arith.constant 0 : i32
    return %c0_i32, %c0_i32_0 : i32, i32
  }
  func.func @transform_2(%arg0: i32) -> (i32, i32) {
    %c0_i32 = arith.constant 0 : i32
    %c0_i32_0 = arith.constant 0 : i32
    %c0_i32_1 = arith.constant 0 : i32
    return %c0_i32, %c0_i32_0 : i32, i32
  }
  func.func @transform_3(%arg0: i32) -> (i32, i32) {
    %c0_i32 = arith.constant 0 : i32
    %c0_i32_0 = arith.constant 0 : i32
    return %arg0, %c0_i32 : i32, i32
  }
}

module attributes {stable_mosaic.version = 11 : i64} {
  func.func @_head_kernel(%arg0: i32, %arg1: memref<2x128xbf16, #tpu.memory_space<vmem>>, %arg2: memref<128x32xbf16, #tpu.memory_space<vmem>>, %arg3: memref<1x32xf32, #tpu.memory_space<vmem>>, %arg4: memref<2x16xf32, #tpu.memory_space<vmem>>, %arg5: memref<16x128xbf16, #tpu.memory_space<vmem>>, %arg6: memref<2x128xf32, #tpu.memory_space<vmem>>, %arg7: memref<2x16xf32, #tpu.memory_space<vmem>>, %arg8: memref<2x16xf32, #tpu.memory_space<vmem>>, %arg9: memref<2x128xbf16, #tpu.memory_space<vmem>>) attributes {dimension_semantics = [#tpu.dimension_semantics<arbitrary>], iteration_bounds = array<i64: 1>, scalar_prefetch = 0 : i64, scratch_operands = 0 : i64, tpu.core_type = #tpu.core_type<tc>, window_params = [{pipeline_mode = #tpu.pipeline_mode<synchronous>, transform_indices = @transform_0, window_bounds = array<i64: 2, 128>}, {pipeline_mode = #tpu.pipeline_mode<synchronous>, transform_indices = @transform_1, window_bounds = array<i64: 128, 32>}, {pipeline_mode = #tpu.pipeline_mode<synchronous>, transform_indices = @transform_2, window_bounds = array<i64: 1, 32>}, {pipeline_mode = #tpu.pipeline_mode<synchronous>, transform_indices = @transform_3, window_bounds = array<i64: 2, 16>}, {pipeline_mode = #tpu.pipeline_mode<synchronous>, transform_indices = @transform_4, window_bounds = array<i64: 16, 128>}, {pipeline_mode = #tpu.pipeline_mode<synchronous>, transform_indices = @transform_5, window_bounds = array<i64: 2, 128>}, {pipeline_mode = #tpu.pipeline_mode<synchronous>, transform_indices = @transform_6, window_bounds = array<i64: 2, 16>}, {pipeline_mode = #tpu.pipeline_mode<synchronous>, transform_indices = @transform_7, window_bounds = array<i64: 2, 16>}, {pipeline_mode = #tpu.pipeline_mode<synchronous>, transform_indices = @transform_8, window_bounds = array<i64: 2, 128>}]} {
    %c0 = arith.constant 0 : index
    %c0_0 = arith.constant 0 : index
    %0 = vector.load %arg1[%c0, %c0_0] : memref<2x128xbf16, #tpu.memory_space<vmem>>, vector<2x128xbf16>
    %c0_1 = arith.constant 0 : index
    %c0_2 = arith.constant 0 : index
    %1 = vector.load %arg2[%c0_1, %c0_2] : memref<128x32xbf16, #tpu.memory_space<vmem>>, vector<128x32xbf16>
    %cst = arith.constant dense<0.000000e+00> : vector<2x32xf32>
    %2 = tpu.matmul %0, %1, %cst {dimension_numbers = #tpu.dot_dimension_numbers<[1], [0], [0], [1], [0, 0, 1, 1], [], []>} : vector<2x128xbf16>, vector<128x32xbf16>, vector<2x32xf32> -> vector<2x32xf32>
    %c0_3 = arith.constant 0 : index
    %c0_4 = arith.constant 0 : index
    %3 = vector.load %arg3[%c0_3, %c0_4] : memref<1x32xf32, #tpu.memory_space<vmem>>, vector<1x32xf32>
    %4 = vector.broadcast %3 : vector<1x32xf32> to vector<2x32xf32>
    %5 = arith.addf %2, %4 : vector<2x32xf32>
    %6 = vector.extract_strided_slice %5 {offsets = [0, 0], sizes = [2, 16], strides = [1, 1]} : vector<2x32xf32> to vector<2x16xf32>
    %7 = vector.extract_strided_slice %5 {offsets = [0, 16], sizes = [2, 16], strides = [1, 1]} : vector<2x32xf32> to vector<2x16xf32>
    %c0_5 = arith.constant 0 : index
    %c0_6 = arith.constant 0 : index
    %8 = vector.load %arg4[%c0_5, %c0_6] : memref<2x16xf32, #tpu.memory_space<vmem>>, vector<2x16xf32>
    %cst_7 = arith.constant 5.000000e-01 : f32
    %9 = vector.broadcast %cst_7 : f32 to vector<2x16xf32>
    %10 = arith.mulf %9, %7 : vector<2x16xf32>
    %11 = math.exp %10 : vector<2x16xf32>
    %12 = arith.mulf %8, %11 : vector<2x16xf32>
    %13 = arith.addf %6, %12 : vector<2x16xf32>
    %14 = arith.truncf %13 : vector<2x16xf32> to vector<2x16xbf16>
    %c0_8 = arith.constant 0 : index
    %c0_9 = arith.constant 0 : index
    %15 = vector.load %arg5[%c0_8, %c0_9] : memref<16x128xbf16, #tpu.memory_space<vmem>>, vector<16x128xbf16>
    %cst_10 = arith.constant dense<0.000000e+00> : vector<2x128xf32>
    %16 = tpu.matmul %14, %15, %cst_10 {dimension_numbers = #tpu.dot_dimension_numbers<[1], [0], [0], [1], [0, 0, 1, 1], [], []>} : vector<2x16xbf16>, vector<16x128xbf16>, vector<2x128xf32> -> vector<2x128xf32>
    %c0_11 = arith.constant 0 : index
    %c0_12 = arith.constant 0 : index
    %17 = vector.load %arg6[%c0_11, %c0_12] : memref<2x128xf32, #tpu.memory_space<vmem>>, vector<2x128xf32>
    %18 = arith.addf %16, %17 : vector<2x128xf32>
    %cst_13 = arith.constant 0.000000e+00 : f32
    %19 = vector.broadcast %cst_13 : f32 to vector<2x128xf32>
    %20 = arith.maximumf %18, %19 : vector<2x128xf32>
    %c0_14 = arith.constant 0 : index
    %c0_15 = arith.constant 0 : index
    %21 = vector.load %arg7[%c0_14, %c0_15] : memref<2x16xf32, #tpu.memory_space<vmem>>, vector<2x16xf32>
    tpu.vector_store %arg7[%c0_14, %c0_15], %6 {strides = array<i32>} : memref<2x16xf32, #tpu.memory_space<vmem>>, vector<2x16xf32>,
    %c0_16 = arith.constant 0 : index
    %c0_17 = arith.constant 0 : index
    %22 = vector.load %arg8[%c0_16, %c0_17] : memref<2x16xf32, #tpu.memory_space<vmem>>, vector<2x16xf32>
    tpu.vector_store %arg8[%c0_16, %c0_17], %7 {strides = array<i32>} : memref<2x16xf32, #tpu.memory_space<vmem>>, vector<2x16xf32>,
    %23 = arith.truncf %20 : vector<2x128xf32> to vector<2x128xbf16>
    %c0_18 = arith.constant 0 : index
    %c0_19 = arith.constant 0 : index
    %24 = vector.load %arg9[%c0_18, %c0_19] : memref<2x128xbf16, #tpu.memory_space<vmem>>, vector<2x128xbf16>
    tpu.vector_store %arg9[%c0_18, %c0_19], %23 {strides = array<i32>} : memref<2x128xbf16, #tpu.memory_space<vmem>>, vector<2x128xbf16>,
    return
  }
  func.func @transform_0(%arg0: i32) -> (i32, i32) {
    %c0_i32 = arith.constant 0 : i32
    %c0_i32_0 = arith.constant 0 : i32
    %c0_i32_1 = arith.constant 0 : i32
    return %c0_i32, %c0_i32_0 : i32, i32
  }
  func.func @transform_1(%arg0: i32) -> (i32, i32) {
    %c0_i32 = arith.constant 0 : i32
    %c0_i32_0 = arith.constant 0 : i32
    %c0_i32_1 = arith.constant 0 : i32
    return %c0_i32, %c0_i32_0 : i32, i32
  }
  func.func @transform_2(%arg0: i32) -> (i32, i32) {
    %c0_i32 = arith.constant 0 : i32
    %c0_i32_0 = arith.constant 0 : i32
    %c0_i32_1 = arith.constant 0 : i32
    return %c0_i32, %c0_i32_0 : i32, i32
  }
  func.func @transform_3(%arg0: i32) -> (i32, i32) {
    %c0_i32 = arith.constant 0 : i32
    %c0_i32_0 = arith.constant 0 : i32
    %c0_i32_1 = arith.constant 0 : i32
    return %c0_i32, %c0_i32_0 : i32, i32
  }
  func.func @transform_4(%arg0: i32) -> (i32, i32) {
    %c0_i32 = arith.constant 0 : i32
    %c0_i32_0 = arith.constant 0 : i32
    %c0_i32_1 = arith.constant 0 : i32
    return %c0_i32, %c0_i32_0 : i32, i32
  }
  func.func @transform_5(%arg0: i32) -> (i32, i32) {
    %c0_i32 = arith.constant 0 : i32
    %c0_i32_0 = arith.constant 0 : i32
    %c0_i32_1 = arith.constant 0 : i32
    return %c0_i32, %c0_i32_0 : i32, i32
  }
  func.func @transform_6(%arg0: i32) -> (i32, i32) {
    %c0_i32 = arith.constant 0 : i32
    %c0_i32_0 = arith.constant 0 : i32
    %c0_i32_1 = arith.constant 0 : i32
    return %c0_i32, %c0_i32_0 : i32, i32
  }
  func.func @transform_7(%arg0: i32) -> (i32, i32) {
    %c0_i32 = arith.constant 0 : i32
    %c0_i32_0 = arith.constant 0 : i32
    %c0_i32_1 = arith.constant 0 : i32
    return %c0_i32, %c0_i32_0 : i32, i32
  }
  func.func @transform_8(%arg0: i32) -> (i32, i32) {
    %c0_i32 = arith.constant 0 : i32
    %c0_i32_0 = arith.constant 0 : i32
    %c0_i32_1 = arith.constant 0 : i32
    return %c0_i32, %c0_i32_0 : i32, i32
  }
}

module attributes {stable_mosaic.version = 11 : i64} {
  func.func @_gemm_bias_act_kernel(%arg0: i32, %arg1: memref<256x72xbf16, #tpu.memory_space<vmem>>, %arg2: memref<72x8xbf16, #tpu.memory_space<vmem>>, %arg3: memref<1x8xf32, #tpu.memory_space<vmem>>, %arg4: memref<256x8xbf16, #tpu.memory_space<vmem>>) attributes {dimension_semantics = [#tpu.dimension_semantics<parallel>], iteration_bounds = array<i64: 2>, scalar_prefetch = 0 : i64, scratch_operands = 0 : i64, tpu.core_type = #tpu.core_type<tc>, window_params = [{transform_indices = @transform_0, window_bounds = array<i64: 256, 72>}, {pipeline_mode = #tpu.pipeline_mode<synchronous>, transform_indices = @transform_1, window_bounds = array<i64: 72, 8>}, {pipeline_mode = #tpu.pipeline_mode<synchronous>, transform_indices = @transform_2, window_bounds = array<i64: 1, 8>}, {transform_indices = @transform_3, window_bounds = array<i64: 256, 8>}]} {
    %c0 = arith.constant 0 : index
    %c0_0 = arith.constant 0 : index
    %0 = vector.load %arg1[%c0, %c0_0] : memref<256x72xbf16, #tpu.memory_space<vmem>>, vector<256x72xbf16>
    %c0_1 = arith.constant 0 : index
    %c0_2 = arith.constant 0 : index
    %1 = vector.load %arg2[%c0_1, %c0_2] : memref<72x8xbf16, #tpu.memory_space<vmem>>, vector<72x8xbf16>
    %cst = arith.constant dense<0.000000e+00> : vector<256x8xf32>
    %2 = tpu.matmul %0, %1, %cst {dimension_numbers = #tpu.dot_dimension_numbers<[1], [0], [0], [1], [0, 0, 1, 1], [], []>} : vector<256x72xbf16>, vector<72x8xbf16>, vector<256x8xf32> -> vector<256x8xf32>
    %c0_3 = arith.constant 0 : index
    %c0_4 = arith.constant 0 : index
    %3 = vector.load %arg3[%c0_3, %c0_4] : memref<1x8xf32, #tpu.memory_space<vmem>>, vector<1x8xf32>
    %4 = vector.broadcast %3 : vector<1x8xf32> to vector<256x8xf32>
    %5 = arith.addf %2, %4 : vector<256x8xf32>
    %cst_5 = arith.constant 0.000000e+00 : f32
    %6 = vector.broadcast %cst_5 : f32 to vector<256x8xf32>
    %7 = arith.maximumf %5, %6 : vector<256x8xf32>
    %8 = arith.truncf %7 : vector<256x8xf32> to vector<256x8xbf16>
    %c0_6 = arith.constant 0 : index
    %c0_7 = arith.constant 0 : index
    %9 = vector.load %arg4[%c0_6, %c0_7] : memref<256x8xbf16, #tpu.memory_space<vmem>>, vector<256x8xbf16>
    tpu.vector_store %arg4[%c0_6, %c0_7], %8 {strides = array<i32>} : memref<256x8xbf16, #tpu.memory_space<vmem>>, vector<256x8xbf16>,
    return
  }
  func.func @transform_0(%arg0: i32) -> (i32, i32) {
    %c0_i32 = arith.constant 0 : i32
    %c0_i32_0 = arith.constant 0 : i32
    return %arg0, %c0_i32 : i32, i32
  }
  func.func @transform_1(%arg0: i32) -> (i32, i32) {
    %c0_i32 = arith.constant 0 : i32
    %c0_i32_0 = arith.constant 0 : i32
    %c0_i32_1 = arith.constant 0 : i32
    return %c0_i32, %c0_i32_0 : i32, i32
  }
  func.func @transform_2(%arg0: i32) -> (i32, i32) {
    %c0_i32 = arith.constant 0 : i32
    %c0_i32_0 = arith.constant 0 : i32
    %c0_i32_1 = arith.constant 0 : i32
    return %c0_i32, %c0_i32_0 : i32, i32
  }
  func.func @transform_3(%arg0: i32) -> (i32, i32) {
    %c0_i32 = arith.constant 0 : i32
    %c0_i32_0 = arith.constant 0 : i32
    return %arg0, %c0_i32 : i32, i32
  }
}

module attributes {stable_mosaic.version = 11 : i64} {
  func.func @_gemm_bias_act_kernel(%arg0: i32, %arg1: memref<256x72xbf16, #tpu.memory_space<vmem>>, %arg2: memref<72x4xbf16, #tpu.memory_space<vmem>>, %arg3: memref<1x4xf32, #tpu.memory_space<vmem>>, %arg4: memref<256x4xf32, #tpu.memory_space<vmem>>) attributes {dimension_semantics = [#tpu.dimension_semantics<parallel>], iteration_bounds = array<i64: 2>, scalar_prefetch = 0 : i64, scratch_operands = 0 : i64, tpu.core_type = #tpu.core_type<tc>, window_params = [{transform_indices = @transform_0, window_bounds = array<i64: 256, 72>}, {pipeline_mode = #tpu.pipeline_mode<synchronous>, transform_indices = @transform_1, window_bounds = array<i64: 72, 4>}, {pipeline_mode = #tpu.pipeline_mode<synchronous>, transform_indices = @transform_2, window_bounds = array<i64: 1, 4>}, {transform_indices = @transform_3, window_bounds = array<i64: 256, 4>}]} {
    %c0 = arith.constant 0 : index
    %c0_0 = arith.constant 0 : index
    %0 = vector.load %arg1[%c0, %c0_0] : memref<256x72xbf16, #tpu.memory_space<vmem>>, vector<256x72xbf16>
    %c0_1 = arith.constant 0 : index
    %c0_2 = arith.constant 0 : index
    %1 = vector.load %arg2[%c0_1, %c0_2] : memref<72x4xbf16, #tpu.memory_space<vmem>>, vector<72x4xbf16>
    %cst = arith.constant dense<0.000000e+00> : vector<256x4xf32>
    %2 = tpu.matmul %0, %1, %cst {dimension_numbers = #tpu.dot_dimension_numbers<[1], [0], [0], [1], [0, 0, 1, 1], [], []>} : vector<256x72xbf16>, vector<72x4xbf16>, vector<256x4xf32> -> vector<256x4xf32>
    %c0_3 = arith.constant 0 : index
    %c0_4 = arith.constant 0 : index
    %3 = vector.load %arg3[%c0_3, %c0_4] : memref<1x4xf32, #tpu.memory_space<vmem>>, vector<1x4xf32>
    %4 = vector.broadcast %3 : vector<1x4xf32> to vector<256x4xf32>
    %5 = arith.addf %2, %4 : vector<256x4xf32>
    %6 = arith.negf %5 : vector<256x4xf32>
    %7 = math.exp %6 : vector<256x4xf32>
    %cst_5 = arith.constant 1.000000e+00 : f32
    %8 = vector.broadcast %cst_5 : f32 to vector<256x4xf32>
    %9 = arith.addf %8, %7 : vector<256x4xf32>
    %10 = arith.divf %8, %9 : vector<256x4xf32>
    %c0_6 = arith.constant 0 : index
    %c0_7 = arith.constant 0 : index
    %11 = vector.load %arg4[%c0_6, %c0_7] : memref<256x4xf32, #tpu.memory_space<vmem>>, vector<256x4xf32>
    tpu.vector_store %arg4[%c0_6, %c0_7], %10 {strides = array<i32>} : memref<256x4xf32, #tpu.memory_space<vmem>>, vector<256x4xf32>,
    return
  }
  func.func @transform_0(%arg0: i32) -> (i32, i32) {
    %c0_i32 = arith.constant 0 : i32
    %c0_i32_0 = arith.constant 0 : i32
    return %arg0, %c0_i32 : i32, i32
  }
  func.func @transform_1(%arg0: i32) -> (i32, i32) {
    %c0_i32 = arith.constant 0 : i32
    %c0_i32_0 = arith.constant 0 : i32
    %c0_i32_1 = arith.constant 0 : i32
    return %c0_i32, %c0_i32_0 : i32, i32
  }
  func.func @transform_2(%arg0: i32) -> (i32, i32) {
    %c0_i32 = arith.constant 0 : i32
    %c0_i32_0 = arith.constant 0 : i32
    %c0_i32_1 = arith.constant 0 : i32
    return %c0_i32, %c0_i32_0 : i32, i32
  }
  func.func @transform_3(%arg0: i32) -> (i32, i32) {
    %c0_i32 = arith.constant 0 : i32
    %c0_i32_0 = arith.constant 0 : i32
    return %arg0, %c0_i32 : i32, i32
  }
}

</mosaic_0001>

<bundles_post_ra>
// kernel: vae_forward.7
= control target key start
LH: loop header
LB: loop body
LE: loop exit
PB: predicated region body
PF: predicated region fallthrough
CT: control target
= control target key end

     0   :  { %s1008_s12 = smov 0   ;;  %s1178_s0 = inlined_call_operand.vmem [shape: bf16[512,36], index: 0, kind: input, shape index: {}]   ;;  %s1179_s1 = inlined_call_operand.vmem [shape: bf16[36,8], index: 1, kind: input, shape index: {}]   ;;  %s1180_s2 = inlined_call_operand.vmem [shape: f32[1,8], index: 2, kind: input, shape index: {}]   ;;  %s1181_s3 = inlined_call_operand.vmem [shape: bf16[512,8], index: 3, kind: output, shape index: {}]  }
   0x1 LB: > { %s777_s13 = sadd.s32 4294967295, %s986_s12   ;;  %p781_p0 = scmp.ge.s32.totalorder %s986_s12, 1  ;;  %s986_s12 = sphi %s1008_s12, %s13_s12  }
   0x2   : > { %p138_p1 = scmp.lt.s32.totalorder %s986_s12, 3 }
   0x4   : > { %p139_p2 = pnand %p781_p0, %p138_p1 }
   0x5   : > { %v961_v0 = vld [vmem:[%s1179_s1] sm:$0xff] (!%p139_p2)   ;;  %v962_v1 = vld [vmem:[%s1179_s1 + $0x8] sm:$0xff] (!%p139_p2)   ;;  %s782_s18 = sshll.u32 (!%p139_p2), %s777_s13, 5  ;;  %v963_v2 = vld [vmem:[%s1179_s1 + $0x10] ss:$0 sps:$4 sm:$0x33] (!%p139_p2)  }
   0x6   : > { %142 = sbr.rel (%p139_p2) target bundleno = 265 (0x109), region = 32  ;;  %907 = vmatprep.subr.bf16.mxu0 (!%p139_p2), %v961_v0  ;;  %945 = vmatprep.subr.bf16.mxu1 (!%p139_p2), %v961_v0  ;;  %p163_p3 = scmp.lt.s32.totalorder (!%p139_p2), %s782_s18, 63  ;;  %vm363_vm0 = vcmask (!%p139_p2), 1041408   ;;  %vm314_vm1 = vcmask (!%p139_p2), 293888   ;;  %v1070_v20 = vld [vmem:[%s1180_s2] ss:$0 sm:$0xff] (!%p139_p2) }
   0x7   : > { %908 = vmatpush3.bf16.msra.mxu0 (!%p139_p2), %v961_v0  ;;  %948 = vmatpush3.bf16.msra.mxu1 (!%p139_p2), %v961_v0  ;;  %v365_v3 = vsel (!%p139_p2), %vm363_vm0, %v963_v2, 0  ;;  %vm688_vm2 = vcmask (!%p139_p2), 60416  }
   0x8   : > { %909 = vmatprep.subr.bf16.mxu0 (!%p139_p2), %v962_v1  ;;  %946 = vmatprep.subr.bf16.mxu1 (!%p139_p2), %v962_v1 }
   0xb   : > { %910 = vmatpush3.bf16.msra.mxu0 (!%p139_p2), %v962_v1  ;;  %949 = vmatpush3.bf16.msra.mxu1 (!%p139_p2), %v962_v1 }
   0xc   : > { %951 = vmatprep.subr.msk.bf16.mxu0 (!%p139_p2), %vm363_vm0, %v963_v2  ;;  %952 = vmatprep.subr.msk.bf16.mxu1 (!%p139_p2), %vm363_vm0, %v963_v2 }
   0xd   : > { %s1183_s18 = smov (!%p163_p3, %s782_s18), 63 }
   0xe   : > { %s783_s21 = sshll.u32 %s1183_s18, 2 }
   0xf   : > { %s1033_s24 = scalar_lea.vmem %s1178_s0, %s783_s21  ;;  %912 = vmatpush3.bf16.msra.mxu0 %v365_v3  ;;  %950 = vmatpush3.bf16.msra.mxu1 %v365_v3  ;;  %s1083_s29 = scalar_lea.vmem %s1181_s3, %s783_s21 }
  0x10   : > { %v964_v4 = vld [vmem:[%s1033_s24] sm:$0xff]   ;;  %v966_v6 = vld [vmem:[%s1033_s24 + $0x8] sm:$0xff]   ;;  %v968_v8 = vld [vmem:[%s1033_s24 + $0x10] sm:$0xff]  }
  0x11   : > { %v965_v5 = vld [vmem:[%s1033_s24 + $0x40] sm:$0xff]   ;;  %913 = vmatprep.mubr.msk.bf16.mxu0 %vm314_vm1, %v964_v4  ;;  %v967_v7 = vld [vmem:[%s1033_s24 + $0x48] sm:$0xff]   ;;  %v969_v9 = vld [vmem:[%s1033_s24 + $0x50] sm:$0xff]  }
  0x12   : > { %929 = vmatprep.mubr.msk.bf16.mxu1 %vm314_vm1, %v965_v5  ;;  %914 = vmatmul.mubr.msk.bf16.vlgmr.msra.gmra.mrb[0].mxu0 %vm314_vm1, %v966_v6  ;;  %v970_v10 = vld [vmem:[%s1033_s24 + $0x18] sm:$0xff]   ;;  %v972_v12 = vld [vmem:[%s1033_s24 + $0x20] sm:$0xff]   ;;  %v974_v14 = vld [vmem:[%s1033_s24 + $0x28] sm:$0xff]  }
  0x13   : > { %930 = vmatmul.mubr.msk.bf16.vlgmr.msra.gmra.mrb[0].mxu1 %vm314_vm1, %v967_v7  ;;  %917 = vmatprep.mubr.msk.bf16.mxu0 %vm314_vm1, %v968_v8  ;;  %v971_v11 = vld [vmem:[%s1033_s24 + $0x58] sm:$0xff]   ;;  %v973_v13 = vld [vmem:[%s1033_s24 + $0x60] sm:$0xff]   ;;  %v975_v15 = vld [vmem:[%s1033_s24 + $0x68] sm:$0xff]  }
  0x14   : > { %933 = vmatprep.mubr.msk.bf16.mxu1 %vm314_vm1, %v969_v9  ;;  %v976_v16 = vld [vmem:[%s1033_s24 + $0x30] sm:$0xff]   ;;  %v978_v18 = vld [vmem:[%s1033_s24 + $0x38] sm:$0xff]  }
  0x15   : > { %v977_v17 = vld [vmem:[%s1033_s24 + $0x70] sm:$0xff]   ;;  %v979_v19 = vld [vmem:[%s1033_s24 + $0x78] sm:$0xff]  }
  0x1a   : > { %918 = vmatmul.mubr.msk.bf16.gmra.mrb[4].mxu0 %vm314_vm1, %v970_v10 }
  0x1b   : > { %934 = vmatmul.mubr.msk.bf16.gmra.mrb[4].mxu1 %vm314_vm1, %v971_v11  ;;  %921 = vmatprep.mubr.msk.bf16.mxu0 %vm314_vm1, %v972_v12 }
  0x1c   : > { %937 = vmatprep.mubr.msk.bf16.mxu1 %vm314_vm1, %v973_v13 }
  0x22   : > { %922 = vmatmul.mubr.msk.bf16.gmra.mrb[8].mxu0 %vm314_vm1, %v974_v14 }
  0x23   : > { %938 = vmatmul.mubr.msk.bf16.gmra.mrb[8].mxu1 %vm314_vm1, %v975_v15  ;;  %925 = vmatprep.mubr.msk.bf16.mxu0 %vm314_vm1, %v976_v16 }
  0x24   : > { %941 = vmatprep.mubr.msk.bf16.mxu1 %vm314_vm1, %v977_v17 }
  0x2a   : > { %926 = vmatmul.mubr.msk.bf16.gmra.mrb[12].mxu0 %vm314_vm1, %v978_v18 }
  0x2b   : > { %942 = vmatmul.mubr.msk.bf16.gmra.mrb[12].mxu1 %vm314_vm1, %v979_v19 }
  0xe5   : > { %v915_v21 = vpop.f32.mrb[0].mxu0 }
  0xe6   : > { %v931_v22 = vpop.f32.mrb[0].mxu1  ;;  %v410_v23 = vadd.f32 %v915_v21, %v1070_v20  ;;  %v401_v25 = vpop.f32.mrb[1].mxu0 }
  0xe7   : > { %v474_v24 = vadd.f32 %v931_v22, %v1070_v20  ;;  %v465_v26 = vpop.f32.mrb[1].mxu1  ;;  %v402_v27 = vadd.f32 %v1070_v20, %v401_v25  ;;  %v916_v29 = vpop.f32.mrb[2].mxu0 }
  0xe8   : > { %v466_v28 = vadd.f32 %v1070_v20, %v465_v26  ;;  %v932_v30 = vpop.f32.mrb[2].mxu1  ;;  %v530_v31 = vmax.f32 %v410_v23, 0.0  ;;  %v413_v33 = vadd.f32 %v916_v29, %v1070_v20  ;;  %v404_v35 = vpop.f32.mrb[3].mxu0 }
  0xe9   : > { %v546_v32 = vmax.f32 %v474_v24, 0.0  ;;  %v477_v34 = vadd.f32 %v932_v30, %v1070_v20  ;;  %v468_v36 = vpop.f32.mrb[3].mxu1  ;;  %v528_v37 = vmax.f32 %v402_v27, 0.0  ;;  %v405_v39 = vadd.f32 %v1070_v20, %v404_v35 }
  0xea   : > { %v544_v38 = vmax.f32 %v466_v28, 0.0  ;;  %v469_v40 = vadd.f32 %v1070_v20, %v468_v36  ;;  %v858_v41 = vpack.c.bf16 %v530_v31, %v530_v31  ;;  %v531_v43 = vmax.f32 %v413_v33, 0.0 }
  0xeb   : > { %v874_v42 = vpack.c.bf16 %v546_v32, %v546_v32  ;;  %v547_v44 = vmax.f32 %v477_v34, 0.0  ;;  %v856_v45 = vpack.c.bf16 %v528_v37, %v528_v37  ;;  %v529_v47 = vmax.f32 %v405_v39, 0.0 }
  0xec   : > { %v872_v46 = vpack.c.bf16 %v544_v38, %v544_v38  ;;  %v545_v48 = vmax.f32 %v469_v40, 0.0  ;;  %691 = vst.msk [vmem:[%s1083_s29 + $0x8] sm:$0xf] %vm688_vm2, %v858_v41  ;;  %v859_v49 = vpack.c.bf16 %v531_v43, %v531_v43 }
  0xed   : > { %707 = vst.msk [vmem:[%s1083_s29 + $0x48] sm:$0xf] %vm688_vm2, %v874_v42  ;;  %v875_v50 = vpack.c.bf16 %v547_v44, %v547_v44  ;;  %689 = vst.msk [vmem:[%s1083_s29] sm:$0xf] %vm688_vm2, %v856_v45  ;;  %v857_v51 = vpack.c.bf16 %v529_v47, %v529_v47  ;;  %v919_v53 = vpop.f32.mrb[4].mxu0 }
  0xee   : > { %705 = vst.msk [vmem:[%s1083_s29 + $0x40] sm:$0xf] %vm688_vm2, %v872_v46  ;;  %v873_v52 = vpack.c.bf16 %v545_v48, %v545_v48  ;;  %v935_v54 = vpop.f32.mrb[4].mxu1  ;;  %692 = vst.msk [vmem:[%s1083_s29 + $0xc] sm:$0xf] %vm688_vm2, %v859_v49  ;;  %v426_v55 = vadd.f32 %v919_v53, %v1070_v20  ;;  %v417_v57 = vpop.f32.mrb[5].mxu0 }
  0xef   : > { %708 = vst.msk [vmem:[%s1083_s29 + $0x4c] sm:$0xf] %vm688_vm2, %v875_v50  ;;  %v490_v56 = vadd.f32 %v935_v54, %v1070_v20  ;;  %v481_v58 = vpop.f32.mrb[5].mxu1  ;;  %690 = vst.msk [vmem:[%s1083_s29 + $0x4] sm:$0xf] %vm688_vm2, %v857_v51  ;;  %v418_v59 = vadd.f32 %v1070_v20, %v417_v57  ;;  %v920_v61 = vpop.f32.mrb[6].mxu0 }
  0xf0   : > { %706 = vst.msk [vmem:[%s1083_s29 + $0x44] sm:$0xf] %vm688_vm2, %v873_v52  ;;  %v482_v60 = vadd.f32 %v1070_v20, %v481_v58  ;;  %v936_v62 = vpop.f32.mrb[6].mxu1  ;;  %v534_v63 = vmax.f32 %v426_v55, 0.0  ;;  %v429_v1 = vadd.f32 %v920_v61, %v1070_v20  ;;  %v420_v3 = vpop.f32.mrb[7].mxu0 }
  0xf1   : > { %v550_v0 = vmax.f32 %v490_v56, 0.0  ;;  %v493_v2 = vadd.f32 %v936_v62, %v1070_v20  ;;  %v484_v4 = vpop.f32.mrb[7].mxu1  ;;  %v532_v5 = vmax.f32 %v418_v59, 0.0  ;;  %v421_v7 = vadd.f32 %v1070_v20, %v420_v3 }
  0xf2   : > { %v548_v6 = vmax.f32 %v482_v60, 0.0  ;;  %v485_v8 = vadd.f32 %v1070_v20, %v484_v4  ;;  %v862_v9 = vpack.c.bf16 %v534_v63, %v534_v63  ;;  %v535_v11 = vmax.f32 %v429_v1, 0.0 }
  0xf3   : > { %v878_v10 = vpack.c.bf16 %v550_v0, %v550_v0  ;;  %v551_v12 = vmax.f32 %v493_v2, 0.0  ;;  %v860_v13 = vpack.c.bf16 %v532_v5, %v532_v5  ;;  %v533_v15 = vmax.f32 %v421_v7, 0.0 }
  0xf4   : > { %v876_v14 = vpack.c.bf16 %v548_v6, %v548_v6  ;;  %v549_v16 = vmax.f32 %v485_v8, 0.0  ;;  %695 = vst.msk [vmem:[%s1083_s29 + $0x18] sm:$0xf] %vm688_vm2, %v862_v9  ;;  %v863_v17 = vpack.c.bf16 %v535_v11, %v535_v11 }
  0xf5   : > { %711 = vst.msk [vmem:[%s1083_s29 + $0x58] sm:$0xf] %vm688_vm2, %v878_v10  ;;  %v879_v18 = vpack.c.bf16 %v551_v12, %v551_v12  ;;  %693 = vst.msk [vmem:[%s1083_s29 + $0x10] sm:$0xf] %vm688_vm2, %v860_v13  ;;  %v861_v19 = vpack.c.bf16 %v533_v15, %v533_v15  ;;  %v923_v22 = vpop.f32.mrb[8].mxu0 }
  0xf6   : > { %709 = vst.msk [vmem:[%s1083_s29 + $0x50] sm:$0xf] %vm688_vm2, %v876_v14  ;;  %v877_v21 = vpack.c.bf16 %v549_v16, %v549_v16  ;;  %v939_v23 = vpop.f32.mrb[8].mxu1  ;;  %696 = vst.msk [vmem:[%s1083_s29 + $0x1c] sm:$0xf] %vm688_vm2, %v863_v17  ;;  %v442_v24 = vadd.f32 %v923_v22, %v1070_v20  ;;  %v433_v26 = vpop.f32.mrb[9].mxu0 }
  0xf7   : > { %712 = vst.msk [vmem:[%s1083_s29 + $0x5c] sm:$0xf] %vm688_vm2, %v879_v18  ;;  %v506_v25 = vadd.f32 %v939_v23, %v1070_v20  ;;  %v497_v27 = vpop.f32.mrb[9].mxu1  ;;  %694 = vst.msk [vmem:[%s1083_s29 + $0x14] sm:$0xf] %vm688_vm2, %v861_v19  ;;  %v434_v28 = vadd.f32 %v1070_v20, %v433_v26  ;;  %v924_v30 = vpop.f32.mrb[10].mxu0 }
  0xf8   : > { %710 = vst.msk [vmem:[%s1083_s29 + $0x54] sm:$0xf] %vm688_vm2, %v877_v21  ;;  %v498_v29 = vadd.f32 %v1070_v20, %v497_v27  ;;  %v940_v31 = vpop.f32.mrb[10].mxu1  ;;  %v538_v32 = vmax.f32 %v442_v24, 0.0  ;;  %v445_v34 = vadd.f32 %v924_v30, %v1070_v20  ;;  %v436_v36 = vpop.f32.mrb[11].mxu0 }
  0xf9   : > { %v554_v33 = vmax.f32 %v506_v25, 0.0  ;;  %v509_v35 = vadd.f32 %v940_v31, %v1070_v20  ;;  %v500_v37 = vpop.f32.mrb[11].mxu1  ;;  %v536_v38 = vmax.f32 %v434_v28, 0.0  ;;  %v437_v40 = vadd.f32 %v1070_v20, %v436_v36 }
  0xfa   : > { %v552_v39 = vmax.f32 %v498_v29, 0.0  ;;  %v501_v41 = vadd.f32 %v1070_v20, %v500_v37  ;;  %v866_v42 = vpack.c.bf16 %v538_v32, %v538_v32  ;;  %v539_v44 = vmax.f32 %v445_v34, 0.0 }
  0xfb   : > { %v882_v43 = vpack.c.bf16 %v554_v33, %v554_v33  ;;  %v555_v45 = vmax.f32 %v509_v35, 0.0  ;;  %v864_v46 = vpack.c.bf16 %v536_v38, %v536_v38  ;;  %v537_v48 = vmax.f32 %v437_v40, 0.0 }
  0xfc   : > { %v880_v47 = vpack.c.bf16 %v552_v39, %v552_v39  ;;  %v553_v49 = vmax.f32 %v501_v41, 0.0  ;;  %699 = vst.msk [vmem:[%s1083_s29 + $0x28] sm:$0xf] %vm688_vm2, %v866_v42  ;;  %v867_v50 = vpack.c.bf16 %v539_v44, %v539_v44 }
  0xfd   : > { %715 = vst.msk [vmem:[%s1083_s29 + $0x68] sm:$0xf] %vm688_vm2, %v882_v43  ;;  %v883_v51 = vpack.c.bf16 %v555_v45, %v555_v45  ;;  %697 = vst.msk [vmem:[%s1083_s29 + $0x20] sm:$0xf] %vm688_vm2, %v864_v46  ;;  %v865_v52 = vpack.c.bf16 %v537_v48, %v537_v48  ;;  %v927_v54 = vpop.f32.mrb[12].mxu0 }
  0xfe   : > { %713 = vst.msk [vmem:[%s1083_s29 + $0x60] sm:$0xf] %vm688_vm2, %v880_v47  ;;  %v881_v53 = vpack.c.bf16 %v553_v49, %v553_v49  ;;  %v943_v55 = vpop.f32.mrb[12].mxu1  ;;  %700 = vst.msk [vmem:[%s1083_s29 + $0x2c] sm:$0xf] %vm688_vm2, %v867_v50  ;;  %v458_v56 = vadd.f32 %v927_v54, %v1070_v20  ;;  %v449_v58 = vpop.f32.mrb[13].mxu0 }
  0xff   : > { %716 = vst.msk [vmem:[%s1083_s29 + $0x6c] sm:$0xf] %vm688_vm2, %v883_v51  ;;  %v522_v57 = vadd.f32 %v943_v55, %v1070_v20  ;;  %v513_v59 = vpop.f32.mrb[13].mxu1  ;;  %698 = vst.msk [vmem:[%s1083_s29 + $0x24] sm:$0xf] %vm688_vm2, %v865_v52  ;;  %v450_v60 = vadd.f32 %v1070_v20, %v449_v58  ;;  %v928_v62 = vpop.f32.mrb[14].mxu0 }
 0x100   : > { %714 = vst.msk [vmem:[%s1083_s29 + $0x64] sm:$0xf] %vm688_vm2, %v881_v53  ;;  %v514_v61 = vadd.f32 %v1070_v20, %v513_v59  ;;  %v944_v63 = vpop.f32.mrb[14].mxu1  ;;  %v542_v0 = vmax.f32 %v458_v56, 0.0  ;;  %v461_v2 = vadd.f32 %v928_v62, %v1070_v20  ;;  %v452_v4 = vpop.f32.mrb[15].mxu0 }
 0x101   : > { %v558_v1 = vmax.f32 %v522_v57, 0.0  ;;  %v525_v3 = vadd.f32 %v944_v63, %v1070_v20  ;;  %v516_v5 = vpop.f32.mrb[15].mxu1  ;;  %v540_v6 = vmax.f32 %v450_v60, 0.0  ;;  %v453_v8 = vadd.f32 %v1070_v20, %v452_v4 }
 0x102   : > { %v556_v7 = vmax.f32 %v514_v61, 0.0  ;;  %v517_v9 = vadd.f32 %v1070_v20, %v516_v5  ;;  %v870_v10 = vpack.c.bf16 %v542_v0, %v542_v0  ;;  %v543_v12 = vmax.f32 %v461_v2, 0.0 }
 0x103   : > { %v886_v11 = vpack.c.bf16 %v558_v1, %v558_v1  ;;  %v559_v13 = vmax.f32 %v525_v3, 0.0  ;;  %v868_v14 = vpack.c.bf16 %v540_v6, %v540_v6  ;;  %v541_v16 = vmax.f32 %v453_v8, 0.0 }
 0x104   : > { %v884_v15 = vpack.c.bf16 %v556_v7, %v556_v7  ;;  %v557_v17 = vmax.f32 %v517_v9, 0.0  ;;  %703 = vst.msk [vmem:[%s1083_s29 + $0x38] sm:$0xf] %vm688_vm2, %v870_v10  ;;  %v871_v18 = vpack.c.bf16 %v543_v12, %v543_v12 }
 0x105   : > { %719 = vst.msk [vmem:[%s1083_s29 + $0x78] sm:$0xf] %vm688_vm2, %v886_v11  ;;  %v887_v19 = vpack.c.bf16 %v559_v13, %v559_v13  ;;  %701 = vst.msk [vmem:[%s1083_s29 + $0x30] sm:$0xf] %vm688_vm2, %v868_v14  ;;  %v869_v20 = vpack.c.bf16 %v541_v16, %v541_v16 }
 0x106   : > { %717 = vst.msk [vmem:[%s1083_s29 + $0x70] sm:$0xf] %vm688_vm2, %v884_v15  ;;  %v885_v21 = vpack.c.bf16 %v557_v17, %v557_v17  ;;  %704 = vst.msk [vmem:[%s1083_s29 + $0x3c] sm:$0xf] %vm688_vm2, %v871_v18 }
 0x107   : > { %720 = vst.msk [vmem:[%s1083_s29 + $0x7c] sm:$0xf] %vm688_vm2, %v887_v19  ;;  %702 = vst.msk [vmem:[%s1083_s29 + $0x34] sm:$0xf] %vm688_vm2, %v869_v20 }
 0x108   : > { %718 = vst.msk [vmem:[%s1083_s29 + $0x74] sm:$0xf] %vm688_vm2, %v885_v21 }
 0x109 PF: > { %s13_s12 = sadd.s32 1, %s986_s12  }
 0x10a   : > { %p10_p4 = scmp.ge.s32.totalorder %s13_s12, 4  }
 0x10c   :  { %12 = sbr.rel (!%p10_p4) target bundleno = 1 (0x1), region = 62 }

// kernel: vae_forward.8
= control target key start
LH: loop header
LB: loop body
LE: loop exit
PB: predicated region body
PF: predicated region fallthrough
CT: control target
= control target key end

     0   :  { %vm114_vm0 = vcmask 588800   ;;  %vm139_vm1 = vcmask 1043456   ;;  %vm320_vm2 = vcmask 60416   ;;  %s593_s1 = inlined_call_operand.vmem [shape: bf16[72,8], index: 1, kind: input, shape index: {}]   ;;  %s594_s0 = inlined_call_operand.vmem [shape: bf16[128,72], index: 0, kind: input, shape index: {}]   ;;  %s595_s2 = inlined_call_operand.vmem [shape: f32[1,8], index: 2, kind: input, shape index: {}]   ;;  %s596_s3 = inlined_call_operand.vmem [shape: bf16[128,8], index: 3, kind: output, shape index: {}]  }
   0x1   :  { %v446_v0 = vld [vmem:[%s593_s1] sm:$0xff]   ;;  %v447_v1 = vld [vmem:[%s593_s1 + $0x8] sm:$0xff]   ;;  %v448_v2 = vld [vmem:[%s593_s1 + $0x10] sm:$0xff]  }
   0x2   :  { %408 = vmatprep.subr.bf16.mxu0 %v446_v0  ;;  %434 = vmatprep.subr.bf16.mxu1 %v446_v0  ;;  %v451_v3 = vld [vmem:[%s594_s0] sm:$0xff]   ;;  %v449_v5 = vld [vmem:[%s593_s1 + $0x18] sm:$0xff]   ;;  %v453_v8 = vld [vmem:[%s594_s0 + $0x8] sm:$0xff]  }
   0x3   :  { %409 = vmatpush3.bf16.msra.mxu0 %v446_v0  ;;  %439 = vmatpush3.bf16.msra.mxu1 %v446_v0  ;;  %v452_v4 = vld [vmem:[%s594_s0 + $0x20] sm:$0xff]   ;;  %v454_v9 = vld [vmem:[%s594_s0 + $0x28] sm:$0xff]   ;;  %v455_v10 = vld [vmem:[%s594_s0 + $0x10] sm:$0xff]  }
   0x4   :  { %410 = vmatprep.subr.bf16.mxu0 %v447_v1  ;;  %435 = vmatprep.subr.bf16.mxu1 %v447_v1  ;;  %v450_v6 = vld [vmem:[%s593_s1 + $0x20] ss:$0 sps:$4 sm:$0xff]   ;;  %v456_v11 = vld [vmem:[%s594_s0 + $0x30] sm:$0xff]   ;;  %v457_v12 = vld [vmem:[%s594_s0 + $0x18] sm:$0xff]  }
   0x5   :  { %418 = vmatprep.mubr.msk.bf16.mxu0 %vm114_vm0, %v451_v3  ;;  %426 = vmatprep.mubr.msk.bf16.mxu1 %vm114_vm0, %v452_v4  ;;  %v141_v7 = vsel %vm139_vm1, %v450_v6, 0  ;;  %v458_v13 = vld [vmem:[%s594_s0 + $0x38] sm:$0xff]   ;;  %v341_v14 = vld [vmem:[%s595_s2] ss:$0 sm:$0xff] }
   0x7   :  { %411 = vmatpush3.bf16.msra.mxu0 %v447_v1  ;;  %440 = vmatpush3.bf16.msra.mxu1 %v447_v1 }
   0x8   :  { %412 = vmatprep.subr.bf16.mxu0 %v448_v2  ;;  %436 = vmatprep.subr.bf16.mxu1 %v448_v2 }
   0xb   :  { %413 = vmatpush3.bf16.msra.mxu0 %v448_v2  ;;  %441 = vmatpush3.bf16.msra.mxu1 %v448_v2 }
   0xc   :  { %414 = vmatprep.subr.bf16.mxu0 %v449_v5  ;;  %437 = vmatprep.subr.bf16.mxu1 %v449_v5 }
   0xf   :  { %415 = vmatpush3.bf16.msra.mxu0 %v449_v5  ;;  %442 = vmatpush3.bf16.msra.mxu1 %v449_v5 }
  0x10   :  { %444 = vmatprep.subr.msk.bf16.mxu0 %vm139_vm1, %v450_v6  ;;  %445 = vmatprep.subr.msk.bf16.mxu1 %vm139_vm1, %v450_v6 }
  0x13   :  { %417 = vmatpush3.bf16.msra.mxu0 %v141_v7  ;;  %443 = vmatpush3.bf16.msra.mxu1 %v141_v7 }
  0x16   :  { %419 = vmatmul.mubr.msk.bf16.vlgmr.msra.gmra.mrb[0].mxu0 %vm114_vm0, %v453_v8  ;;  %427 = vmatmul.mubr.msk.bf16.vlgmr.msra.gmra.mrb[0].mxu1 %vm114_vm0, %v454_v9 }
  0x17   :  { %422 = vmatprep.mubr.msk.bf16.mxu0 %vm114_vm0, %v455_v10  ;;  %430 = vmatprep.mubr.msk.bf16.mxu1 %vm114_vm0, %v456_v11 }
  0x1e   :  { %423 = vmatmul.mubr.msk.bf16.gmra.mrb[4].mxu0 %vm114_vm0, %v457_v12  ;;  %431 = vmatmul.mubr.msk.bf16.gmra.mrb[4].mxu1 %vm114_vm0, %v458_v13 }
  0xe9   :  { %v420_v15 = vpop.f32.mrb[0].mxu0  ;;  %v428_v16 = vpop.f32.mrb[0].mxu1 }
  0xea   :  { %v186_v17 = vadd.f32 %v420_v15, %v341_v14  ;;  %v218_v18 = vadd.f32 %v428_v16, %v341_v14  ;;  %v177_v19 = vpop.f32.mrb[1].mxu0  ;;  %v209_v20 = vpop.f32.mrb[1].mxu1 }
  0xeb   :  { %v178_v21 = vadd.f32 %v341_v14, %v177_v19  ;;  %v210_v22 = vadd.f32 %v341_v14, %v209_v20  ;;  %v421_v23 = vpop.f32.mrb[2].mxu0  ;;  %v429_v24 = vpop.f32.mrb[2].mxu1 }
  0xec   :  { %v242_v25 = vmax.f32 %v186_v17, 0.0  ;;  %v250_v26 = vmax.f32 %v218_v18, 0.0  ;;  %v189_v27 = vadd.f32 %v421_v23, %v341_v14  ;;  %v221_v28 = vadd.f32 %v429_v24, %v341_v14  ;;  %v180_v29 = vpop.f32.mrb[3].mxu0  ;;  %v212_v30 = vpop.f32.mrb[3].mxu1 }
  0xed   :  { %v240_v31 = vmax.f32 %v178_v21, 0.0  ;;  %v248_v32 = vmax.f32 %v210_v22, 0.0  ;;  %v181_v33 = vadd.f32 %v341_v14, %v180_v29  ;;  %v213_v34 = vadd.f32 %v341_v14, %v212_v30 }
  0xee   :  { %v381_v35 = vpack.c.bf16 %v242_v25, %v242_v25  ;;  %v389_v36 = vpack.c.bf16 %v250_v26, %v250_v26  ;;  %v243_v37 = vmax.f32 %v189_v27, 0.0  ;;  %v251_v38 = vmax.f32 %v221_v28, 0.0 }
  0xef   :  { %v379_v39 = vpack.c.bf16 %v240_v31, %v240_v31  ;;  %v387_v40 = vpack.c.bf16 %v248_v32, %v248_v32  ;;  %v241_v41 = vmax.f32 %v181_v33, 0.0  ;;  %v249_v42 = vmax.f32 %v213_v34, 0.0 }
  0xf0   :  { %323 = vst.msk [vmem:[%s596_s3 + $0x8] sm:$0xf] %vm320_vm2, %v381_v35  ;;  %331 = vst.msk [vmem:[%s596_s3 + $0x28] sm:$0xf] %vm320_vm2, %v389_v36  ;;  %v382_v43 = vpack.c.bf16 %v243_v37, %v243_v37  ;;  %v390_v44 = vpack.c.bf16 %v251_v38, %v251_v38 }
  0xf1   :  { %321 = vst.msk [vmem:[%s596_s3] sm:$0xf] %vm320_vm2, %v379_v39  ;;  %329 = vst.msk [vmem:[%s596_s3 + $0x20] sm:$0xf] %vm320_vm2, %v387_v40  ;;  %v380_v45 = vpack.c.bf16 %v241_v41, %v241_v41  ;;  %v388_v46 = vpack.c.bf16 %v249_v42, %v249_v42  ;;  %v424_v47 = vpop.f32.mrb[4].mxu0  ;;  %v432_v48 = vpop.f32.mrb[4].mxu1 }
  0xf2   :  { %324 = vst.msk [vmem:[%s596_s3 + $0xc] sm:$0xf] %vm320_vm2, %v382_v43  ;;  %332 = vst.msk [vmem:[%s596_s3 + $0x2c] sm:$0xf] %vm320_vm2, %v390_v44  ;;  %v202_v49 = vadd.f32 %v424_v47, %v341_v14  ;;  %v234_v50 = vadd.f32 %v432_v48, %v341_v14  ;;  %v193_v51 = vpop.f32.mrb[5].mxu0  ;;  %v225_v52 = vpop.f32.mrb[5].mxu1 }
  0xf3   :  { %322 = vst.msk [vmem:[%s596_s3 + $0x4] sm:$0xf] %vm320_vm2, %v380_v45  ;;  %330 = vst.msk [vmem:[%s596_s3 + $0x24] sm:$0xf] %vm320_vm2, %v388_v46  ;;  %v194_v53 = vadd.f32 %v341_v14, %v193_v51  ;;  %v226_v54 = vadd.f32 %v341_v14, %v225_v52  ;;  %v425_v55 = vpop.f32.mrb[6].mxu0  ;;  %v433_v56 = vpop.f32.mrb[6].mxu1 }
  0xf4   :  { %v246_v57 = vmax.f32 %v202_v49, 0.0  ;;  %v254_v58 = vmax.f32 %v234_v50, 0.0  ;;  %v205_v59 = vadd.f32 %v425_v55, %v341_v14  ;;  %v237_v60 = vadd.f32 %v433_v56, %v341_v14  ;;  %v196_v61 = vpop.f32.mrb[7].mxu0  ;;  %v228_v62 = vpop.f32.mrb[7].mxu1 }
  0xf5   :  { %v244_v63 = vmax.f32 %v194_v53, 0.0  ;;  %v252_v0 = vmax.f32 %v226_v54, 0.0  ;;  %v197_v1 = vadd.f32 %v341_v14, %v196_v61  ;;  %v229_v2 = vadd.f32 %v341_v14, %v228_v62 }
  0xf6   :  { %v385_v3 = vpack.c.bf16 %v246_v57, %v246_v57  ;;  %v393_v4 = vpack.c.bf16 %v254_v58, %v254_v58  ;;  %v247_v5 = vmax.f32 %v205_v59, 0.0  ;;  %v255_v6 = vmax.f32 %v237_v60, 0.0 }
  0xf7   :  { %v383_v7 = vpack.c.bf16 %v244_v63, %v244_v63  ;;  %v391_v8 = vpack.c.bf16 %v252_v0, %v252_v0  ;;  %v245_v9 = vmax.f32 %v197_v1, 0.0  ;;  %v253_v10 = vmax.f32 %v229_v2, 0.0 }
  0xf8   :  { %327 = vst.msk [vmem:[%s596_s3 + $0x18] sm:$0xf] %vm320_vm2, %v385_v3  ;;  %335 = vst.msk [vmem:[%s596_s3 + $0x38] sm:$0xf] %vm320_vm2, %v393_v4  ;;  %v386_v11 = vpack.c.bf16 %v247_v5, %v247_v5  ;;  %v394_v12 = vpack.c.bf16 %v255_v6, %v255_v6 }
  0xf9   :  { %325 = vst.msk [vmem:[%s596_s3 + $0x10] sm:$0xf] %vm320_vm2, %v383_v7  ;;  %333 = vst.msk [vmem:[%s596_s3 + $0x30] sm:$0xf] %vm320_vm2, %v391_v8  ;;  %v384_v13 = vpack.c.bf16 %v245_v9, %v245_v9  ;;  %v392_v14 = vpack.c.bf16 %v253_v10, %v253_v10 }
  0xfa   :  { %328 = vst.msk [vmem:[%s596_s3 + $0x1c] sm:$0xf] %vm320_vm2, %v386_v11  ;;  %336 = vst.msk [vmem:[%s596_s3 + $0x3c] sm:$0xf] %vm320_vm2, %v394_v12 }
  0xfb   :  { %326 = vst.msk [vmem:[%s596_s3 + $0x14] sm:$0xf] %vm320_vm2, %v384_v13  ;;  %334 = vst.msk [vmem:[%s596_s3 + $0x34] sm:$0xf] %vm320_vm2, %v392_v14 }

// kernel: vae_forward.9
= control target key start
LH: loop header
LB: loop body
LE: loop exit
PB: predicated region body
PF: predicated region fallthrough
CT: control target
= control target key end

     0   :  { %vm72_vm0 = vcmask 588800   ;;  %vm79_vm1 = vcmask 1043456   ;;  %vm152_vm2 = vcmask 60416   ;;  %s264_s1 = inlined_call_operand.vmem [shape: bf16[72,8], index: 1, kind: input, shape index: {}]   ;;  %s265_s0 = inlined_call_operand.vmem [shape: bf16[32,72], index: 0, kind: input, shape index: {}]   ;;  %s266_s2 = inlined_call_operand.vmem [shape: f32[1,8], index: 2, kind: input, shape index: {}]   ;;  %s267_s3 = inlined_call_operand.vmem [shape: bf16[32,8], index: 3, kind: output, shape index: {}]  }
   0x1   :  { %v201_v0 = vld [vmem:[%s264_s1] sm:$0xff]   ;;  %v202_v1 = vld [vmem:[%s264_s1 + $0x8] sm:$0xff]   ;;  %v203_v2 = vld [vmem:[%s264_s1 + $0x10] sm:$0xff]  }
   0x2   :  { %186 = vmatprep.subr.bf16.mxu0 %v201_v0  ;;  %v206_v3 = vld [vmem:[%s265_s0] sm:$0xff]   ;;  %v204_v4 = vld [vmem:[%s264_s1 + $0x18] sm:$0xff]   ;;  %v207_v7 = vld [vmem:[%s265_s0 + $0x8] sm:$0xff]  }
   0x3   :  { %187 = vmatpush3.bf16.msra.mxu0 %v201_v0  ;;  %196 = vmatprep.mubr.msk.bf16.mxu0 %vm72_vm0, %v206_v3  ;;  %v205_v5 = vld [vmem:[%s264_s1 + $0x20] ss:$0 sps:$4 sm:$0xff]  }
   0x4   :  { %188 = vmatprep.subr.bf16.mxu0 %v202_v1  ;;  %v81_v6 = vsel %vm79_vm1, %v205_v5, 0  ;;  %v161_v8 = vld [vmem:[%s266_s2] ss:$0 sm:$0xff] }
   0x7   :  { %189 = vmatpush3.bf16.msra.mxu0 %v202_v1 }
   0x8   :  { %190 = vmatprep.subr.bf16.mxu0 %v203_v2 }
   0xb   :  { %191 = vmatpush3.bf16.msra.mxu0 %v203_v2 }
   0xc   :  { %192 = vmatprep.subr.bf16.mxu0 %v204_v4 }
   0xf   :  { %193 = vmatpush3.bf16.msra.mxu0 %v204_v4 }
  0x10   :  { %200 = vmatprep.subr.msk.bf16.mxu0 %vm79_vm1, %v205_v5 }
  0x13   :  { %195 = vmatpush3.bf16.msra.mxu0 %v81_v6 }
  0x16   :  { %197 = vmatmul.mubr.msk.bf16.vlgmr.msra.gmra.mrb[0].mxu0 %vm72_vm0, %v207_v7 }
  0xe9   :  { %v198_v9 = vpop.f32.mrb[0].mxu0 }
  0xea   :  { %v126_v10 = vadd.f32 %v198_v9, %v161_v8  ;;  %v117_v11 = vpop.f32.mrb[1].mxu0 }
  0xeb   :  { %v118_v12 = vadd.f32 %v161_v8, %v117_v11  ;;  %v199_v13 = vpop.f32.mrb[2].mxu0 }
  0xec   :  { %v134_v14 = vmax.f32 %v126_v10, 0.0  ;;  %v129_v15 = vadd.f32 %v199_v13, %v161_v8  ;;  %v120_v16 = vpop.f32.mrb[3].mxu0 }
  0xed   :  { %v132_v17 = vmax.f32 %v118_v12, 0.0  ;;  %v121_v18 = vadd.f32 %v161_v8, %v120_v16 }
  0xee   :  { %v177_v19 = vpack.c.bf16 %v134_v14, %v134_v14  ;;  %v135_v20 = vmax.f32 %v129_v15, 0.0 }
  0xef   :  { %v175_v21 = vpack.c.bf16 %v132_v17, %v132_v17  ;;  %v133_v22 = vmax.f32 %v121_v18, 0.0 }
  0xf0   :  { %155 = vst.msk [vmem:[%s267_s3 + $0x8] sm:$0xf] %vm152_vm2, %v177_v19  ;;  %v178_v23 = vpack.c.bf16 %v135_v20, %v135_v20 }
  0xf1   :  { %153 = vst.msk [vmem:[%s267_s3] sm:$0xf] %vm152_vm2, %v175_v21  ;;  %v176_v24 = vpack.c.bf16 %v133_v22, %v133_v22 }
  0xf2   :  { %156 = vst.msk [vmem:[%s267_s3 + $0xc] sm:$0xf] %vm152_vm2, %v178_v23 }
  0xf3   :  { %154 = vst.msk [vmem:[%s267_s3 + $0x4] sm:$0xf] %vm152_vm2, %v176_v24 }

// kernel: vae_forward.10
= control target key start
LH: loop header
LB: loop body
LE: loop exit
PB: predicated region body
PF: predicated region fallthrough
CT: control target
= control target key end

     0   :  { %14 = vsyncpa [#allocation3], 0  ;;  %v359_v1 = vmov 0.0   ;;  %vm360_vm0 = vmmov 0   ;;  %s477_s0 = inlined_call_operand.vmem [shape: bf16[2,128], index: 0, kind: input, shape index: {}]   ;;  %s478_s1 = inlined_call_operand.vmem [shape: bf16[128,32], index: 1, kind: input, shape index: {}]   ;;  %s479_s2 = inlined_call_operand.vmem [shape: f32[1,32], index: 2, kind: input, shape index: {}]   ;;  %s480_s3 = inlined_call_operand.vmem [shape: f32[2,16], index: 3, kind: input, shape index: {}]   ;;  %s481_s4 = inlined_call_operand.vmem [shape: bf16[16,128], index: 4, kind: input, shape index: {}]   ;;  %s482_s5 = inlined_call_operand.vmem [shape: f32[2,128], index: 5, kind: input, shape index: {}]   ;;  %s483_s6 = inlined_call_operand.hbm [shape: f32[2,16], index: 6, kind: output, shape index: {0}]   ;;  %s484_s7 = inlined_call_operand.hbm [shape: f32[2,16], index: 7, kind: output, shape index: {1}]   ;;  %s485_s8 = inlined_call_operand.vmem [shape: bf16[2,128], index: 8, kind: output, shape index: {2}]  }
   0x1   :  { %v300_v0 = vld [vmem:[%s478_s1] sm:$0xff]   ;;  %269 = vmatprep.subr.bf16.mxu0 %v359_v1  ;;  %289 = vmatprep.subr.bf16.mxu1 %v359_v1  ;;  %v301_v2 = vld [vmem:[%s478_s1 + $0x8] sm:$0xff]   ;;  %v302_v3 = vld [vmem:[%s478_s1 + $0x10] sm:$0xff]  }
   0x2   :  { %270 = vmatpush3.bf16.msra.mxu0 %v300_v0  ;;  %285 = vmatprep.mubr.msk.bf16.mxu0 %vm360_vm0, %v359_v1 }
   0x3   :  { %271 = vmatprep.subr.bf16.mxu0 %v359_v1  ;;  %291 = vmatprep.mubr.msk.bf16.mxu1 %vm360_vm0, %v359_v1 }
   0x6   :  { %272 = vmatpush3.bf16.msra.mxu0 %v301_v2 }
   0x7   :  { %273 = vmatprep.subr.bf16.mxu0 %v359_v1 }
   0x8   :  { %15 = vsyncpa [#allocation5], 0  ;;  %v303_v4 = vld [vmem:[%s478_s1 + $0x18] sm:$0xff]   ;;  %v304_v5 = vld [vmem:[%s478_s1 + $0x20] sm:$0xff]   ;;  %vm206_vm1 = vcmask 123904   ;;  %vm161_vm2 = vcmask 130048  }
   0x9   :  { %v305_v6 = vld [vmem:[%s478_s1 + $0x28] sm:$0xff]   ;;  %v306_v7 = vld [vmem:[%s478_s1 + $0x30] sm:$0xff]   ;;  %v307_v8 = vld [vmem:[%s478_s1 + $0x38] sm:$0xff]   ;;  %s363_s28 = smov [#allocation4]  }
   0xa   :  { %274 = vmatpush3.bf16.msra.mxu0 %v302_v3  ;;  %v29_v9 = vld [vmem:[%s477_s0] sm:$0x1]  ;;  %s361_s0 = smov 112   ;;  %s231_s29 = sshll.u32 %s363_s28, 4  ;;  %s232_s29 = int_to_ptr.vmem [resolvable:$true] %s231_s29 }
   0xb   :  { %275 = vmatprep.subr.bf16.mxu0 %v359_v1  ;;  %v247_v10 = vld [vmem:[%s479_s2] ss:$0 sm:$0xff] }
   0xc   :  { %v308_v18 = vld [vmem:[%s481_s4] sm:$0xff]   ;;  %s362_s4 = smov [#allocation2]  }
   0xd   :  { %290 = vmatpush3.bf16.msra.mxu1 %v308_v18  ;;  %v141_v20 = vld [vmem:[%s480_s3] sm:$0x3]  ;;  %s221_s27 = sshll.u32 %s362_s4, 4  ;;  %s222_s27 = int_to_ptr.vmem [resolvable:$true] %s221_s27 }
   0xe   :  { %276 = vmatpush3.bf16.msra.mxu0 %v303_v4  ;;  %s311_s30 = scalar_lea.vmem %s222_s27, 32  ;;  %p316_p1 = scmp.lt.s32.totalorder %s222_s27, %s222_s27 }
   0xf   :  { %277 = vmatprep.subr.bf16.mxu0 %v359_v1  ;;  %p312_p0 = scmp.ne.s32.totalorder %s222_s27, %s311_s30  ;;  %p317_p2 = scmp.lt.s32.totalorder %s311_s30, %s311_s30 }
  0x11   :  { %p318_p3 = por %p317_p2, %p316_p1 }
  0x12   :  { %278 = vmatpush3.bf16.msra.mxu0 %v304_v5 }
  0x13   :  { %279 = vmatprep.subr.bf16.mxu0 %v359_v1  ;;  %p319_p4 = pnand %p318_p3, %p312_p0 }
  0x16   :  { %280 = vmatpush3.bf16.msra.mxu0 %v305_v6 }
  0x17   :  { %281 = vmatprep.subr.bf16.mxu0 %v359_v1 }
  0x1a   :  { %282 = vmatpush3.bf16.msra.mxu0 %v306_v7 }
  0x1b   :  { %283 = vmatprep.subr.bf16.mxu0 %v359_v1 }
  0x1e   :  { %284 = vmatpush3.bf16.msra.mxu0 %v307_v8 }
  0x21   :  { %286 = vmatmul.mubr.bf16.vlgmr.msra.gmra.mrb[0].mxu0 %v29_v9 }
  0xf4   :  { %v135_v11 = vpop.f32.mrb[0].mxu0 }
  0xf5   :  { %v136_v12 = vadd.f32 %v247_v10, %v135_v11  ;;  %v287_v13 = vpop.f32.mrb[1].mxu0 }
  0xf6   :  { %v138_v14 = vpop.f32.mrb[2].mxu0 }
  0xf7   :  { %v142_v15 = vmul.f32 0.5, %v136_v12  ;;  %v288_v16 = vpop.f32.mrb[3].mxu0  ;;  %207 = vst.msk [vmem:[#allocation2] sm:$0x3] %vm206_vm1, %v136_v12 }
  0xf9   :  { %v143_v17 = vmul.f32 1.442695, %v142_v15 }
  0xfb   :  { %309 = vpow2.f32 %v143_v17 }
 0x105   :  { %v310_v19 = vpop.eup %309 }
 0x106   :  { %146 = vrot.lane.b32.xlu0 %v310_v19, %s361_s0 }
 0x10a   :  { %209 = vrot.lane.b32.xlu0 %v136_v12, %s361_s0 }
 0x178   :  { %v147_v21 = vpop.permute.xlu0 %146 }
 0x179   :  { %v149_v22 = vmul.f32 %v147_v21, %v141_v20 }
 0x17b   :  { %v150_v23 = vadd.f32 %v149_v22, %v136_v12 }
 0x17c   :  { %v210_v24 = vpop.permute.xlu0 %209 }
 0x17d   :  { %v151_v25 = vpack.c.bf16 %v150_v23, %v150_v23  ;;  %212 = vst.msk [vmem:[#allocation4] sm:$0x3] %vm206_vm1, %v210_v24 }
 0x17f   :  { %292 = vmatmul.mubr.msk.bf16.vlgmr.msra.gmra.mrb[0].mxu1 %vm161_vm2, %v151_v25 }
 0x180   :  { %322 = shalt.err (!%p319_p4)
}
 0x181   :  { %s323_s10 = scalar_lea.hbm %s483_s6, 32 }
 0x182   :  { %p324_p5 = scmp.ne.s32.totalorder %s483_s6, %s323_s10  ;;  %p327_p6 = scmp.lt.u32.totalorder %s323_s10, %s483_s6 }
 0x184   :  { %p329_p7 = pnand %p327_p6, %p324_p5 }
 0x186   :  { %332 = shalt.err (!%p329_p7)
}
 0x187   :  { %224 = dma.vmem_to_hbm [thread:$0]  %s222_s27, 32, %s483_s6, [#allocation3]  }
 0x188   :  { %s333_s17 = scalar_lea.vmem %s232_s29, 32  ;;  %p338_p9 = scmp.lt.s32.totalorder %s232_s29, %s232_s29 }
 0x189   :  { %p334_p8 = scmp.ne.s32.totalorder %s232_s29, %s333_s17  ;;  %p339_p10 = scmp.lt.s32.totalorder %s333_s17, %s333_s17 }
 0x18b   :  { %p340_p11 = por %p339_p10, %p338_p9 }
 0x18d   :  { %p341_p12 = pnand %p340_p11, %p334_p8 }
 0x18f   :  { %344 = shalt.err (!%p341_p12)
}
 0x190   :  { %s345_s20 = scalar_lea.hbm %s484_s7, 32 }
 0x191   :  { %p346_p13 = scmp.ne.s32.totalorder %s484_s7, %s345_s20  ;;  %p349_p0 = scmp.lt.u32.totalorder %s345_s20, %s484_s7 }
 0x193   :  { %p351_p1 = pnand %p349_p0, %p346_p13 }
 0x195   :  { %354 = shalt.err (!%p351_p1)
}
 0x196   :  { %234 = dma.vmem_to_hbm [thread:$0]  %s232_s29, 32, %s484_s7, [#allocation5]   ;;  %v154_v26 = vld [vmem:[%s482_s5] sm:$0x3] }
 0x252   :  { %v199_v27 = vpop.f32.mrb[0].mxu1 }
 0x253   :  { %v200_v28 = vadd.f32 %v199_v27, %v154_v26  ;;  %v293_v29 = vpop.f32.mrb[1].mxu1 }
 0x254   :  { %v202_v30 = vpop.f32.mrb[2].mxu1 }
 0x255   :  { %v205_v31 = vmax.f32 %v200_v28, 0.0  ;;  %v294_v32 = vpop.f32.mrb[3].mxu1 }
 0x257   :  { %v213_v33 = vpack.c.bf16 %v205_v31, %v205_v31 }
 0x259   :  { %214 = vst [vmem:[%s485_s8] sm:$0x1] %v213_v33 }
 0x25a   :  { %355 = dma.done.wait [#allocation3], 32  }
 0x25b   :  { %356 = vsyncadd [#allocation3], 4294967264 }
 0x25c   :  { %357 = dma.done.wait [#allocation5], 32  }
 0x25d   :  { %358 = vsyncadd [#allocation5], 4294967264 }
 0x25e   :  { %245 = vsyncpa [#allocation3], 1 }
 0x25f   :  { %246 = vsyncpa [#allocation5], 1 }

// kernel: vae_forward.12
= control target key start
LH: loop header
LB: loop body
LE: loop exit
PB: predicated region body
PF: predicated region fallthrough
CT: control target
= control target key end

     0   :  { %s1038_s12 = smov 0   ;;  %s1214_s0 = inlined_call_operand.vmem [shape: bf16[512,72], index: 0, kind: input, shape index: {}]   ;;  %s1215_s1 = inlined_call_operand.vmem [shape: bf16[72,8], index: 1, kind: input, shape index: {}]   ;;  %s1216_s2 = inlined_call_operand.vmem [shape: f32[1,8], index: 2, kind: input, shape index: {}]   ;;  %s1217_s3 = inlined_call_operand.vmem [shape: bf16[512,8], index: 3, kind: output, shape index: {}]  }
   0x1 LB: > { %s793_s13 = sadd.s32 4294967295, %s1016_s12   ;;  %p797_p0 = scmp.ge.s32.totalorder %s1016_s12, 1  ;;  %s1016_s12 = sphi %s1038_s12, %s13_s12  }
   0x2   : > { %p138_p1 = scmp.lt.s32.totalorder %s1016_s12, 3 }
   0x4   : > { %p139_p2 = pnand %p797_p0, %p138_p1 }
   0x5   : > { %v989_v0 = vld [vmem:[%s1215_s1] sm:$0xff] (!%p139_p2)   ;;  %v990_v1 = vld [vmem:[%s1215_s1 + $0x8] sm:$0xff] (!%p139_p2)   ;;  %s798_s18 = sshll.u32 (!%p139_p2), %s793_s13, 5  ;;  %v991_v2 = vld [vmem:[%s1215_s1 + $0x10] sm:$0xff] (!%p139_p2)   ;;  %vm330_vm0 = vcmask (!%p139_p2), 588800   ;;  %vm379_vm1 = vcmask (!%p139_p2), 1043456  }
   0x6   : > { %142 = sbr.rel (%p139_p2) target bundleno = 272 (0x110), region = 32  ;;  %927 = vmatprep.subr.bf16.mxu0 (!%p139_p2), %v989_v0  ;;  %969 = vmatprep.subr.bf16.mxu1 (!%p139_p2), %v989_v0  ;;  %p163_p3 = scmp.lt.s32.totalorder (!%p139_p2), %s798_s18, 63  ;;  %v992_v3 = vld [vmem:[%s1215_s1 + $0x18] sm:$0xff] (!%p139_p2)   ;;  %v993_v6 = vld [vmem:[%s1215_s1 + $0x20] ss:$0 sps:$4 sm:$0xff] (!%p139_p2)   ;;  %vm704_vm2 = vcmask (!%p139_p2), 60416  }
   0x7   : > { %928 = vmatpush3.bf16.msra.mxu0 (!%p139_p2), %v989_v0  ;;  %974 = vmatpush3.bf16.msra.mxu1 (!%p139_p2), %v989_v0  ;;  %v381_v7 = vsel (!%p139_p2), %vm379_vm1, %v993_v6, 0  ;;  %v1106_v22 = vld [vmem:[%s1216_s2] ss:$0 sm:$0xff] (!%p139_p2) }
   0x8   : > { %929 = vmatprep.subr.bf16.mxu0 (!%p139_p2), %v990_v1  ;;  %970 = vmatprep.subr.bf16.mxu1 (!%p139_p2), %v990_v1 }
   0xb   : > { %930 = vmatpush3.bf16.msra.mxu0 (!%p139_p2), %v990_v1  ;;  %975 = vmatpush3.bf16.msra.mxu1 (!%p139_p2), %v990_v1 }
   0xc   : > { %931 = vmatprep.subr.bf16.mxu0 (!%p139_p2), %v991_v2  ;;  %971 = vmatprep.subr.bf16.mxu1 (!%p139_p2), %v991_v2 }
   0xd   : > { %s1219_s18 = smov (!%p163_p3, %s798_s18), 63 }
   0xe   : > { %s799_s21 = sshll.u32 %s1219_s18, 2 }
   0xf   : > { %s1066_s26 = scalar_lea.vmem %s1214_s0, %s799_s21  ;;  %932 = vmatpush3.bf16.msra.mxu0 %v991_v2  ;;  %976 = vmatpush3.bf16.msra.mxu1 %v991_v2  ;;  %s1119_s6 = scalar_lea.vmem %s1217_s3, %s799_s21 }
  0x10   : > { %v994_v4 = vld [vmem:[%s1066_s26] sm:$0xff]   ;;  %933 = vmatprep.subr.bf16.mxu0 %v992_v3  ;;  %972 = vmatprep.subr.bf16.mxu1 %v992_v3  ;;  %v996_v8 = vld [vmem:[%s1066_s26 + $0x8] sm:$0xff]   ;;  %v998_v10 = vld [vmem:[%s1066_s26 + $0x10] sm:$0xff]  }
  0x11   : > { %v995_v5 = vld [vmem:[%s1066_s26 + $0x40] sm:$0xff]   ;;  %937 = vmatprep.mubr.msk.bf16.mxu0 %vm330_vm0, %v994_v4  ;;  %v997_v9 = vld [vmem:[%s1066_s26 + $0x48] sm:$0xff]   ;;  %v999_v11 = vld [vmem:[%s1066_s26 + $0x50] sm:$0xff]  }
  0x12   : > { %953 = vmatprep.mubr.msk.bf16.mxu1 %vm330_vm0, %v995_v5  ;;  %v1000_v12 = vld [vmem:[%s1066_s26 + $0x18] sm:$0xff]   ;;  %v1002_v14 = vld [vmem:[%s1066_s26 + $0x20] sm:$0xff]   ;;  %v1004_v16 = vld [vmem:[%s1066_s26 + $0x28] sm:$0xff]  }
  0x13   : > { %934 = vmatpush3.bf16.msra.mxu0 %v992_v3  ;;  %977 = vmatpush3.bf16.msra.mxu1 %v992_v3  ;;  %v1001_v13 = vld [vmem:[%s1066_s26 + $0x58] sm:$0xff]   ;;  %v1003_v15 = vld [vmem:[%s1066_s26 + $0x60] sm:$0xff]   ;;  %v1005_v17 = vld [vmem:[%s1066_s26 + $0x68] sm:$0xff]  }
  0x14   : > { %979 = vmatprep.subr.msk.bf16.mxu0 %vm379_vm1, %v993_v6  ;;  %980 = vmatprep.subr.msk.bf16.mxu1 %vm379_vm1, %v993_v6  ;;  %v1006_v18 = vld [vmem:[%s1066_s26 + $0x30] sm:$0xff]   ;;  %v1008_v20 = vld [vmem:[%s1066_s26 + $0x38] sm:$0xff]  }
  0x15   : > { %v1007_v19 = vld [vmem:[%s1066_s26 + $0x70] sm:$0xff]   ;;  %v1009_v21 = vld [vmem:[%s1066_s26 + $0x78] sm:$0xff]  }
  0x17   : > { %936 = vmatpush3.bf16.msra.mxu0 %v381_v7  ;;  %978 = vmatpush3.bf16.msra.mxu1 %v381_v7 }
  0x1a   : > { %938 = vmatmul.mubr.msk.bf16.vlgmr.msra.gmra.mrb[0].mxu0 %vm330_vm0, %v996_v8  ;;  %954 = vmatmul.mubr.msk.bf16.vlgmr.msra.gmra.mrb[0].mxu1 %vm330_vm0, %v997_v9 }
  0x1b   : > { %941 = vmatprep.mubr.msk.bf16.mxu0 %vm330_vm0, %v998_v10  ;;  %957 = vmatprep.mubr.msk.bf16.mxu1 %vm330_vm0, %v999_v11 }
  0x22   : > { %942 = vmatmul.mubr.msk.bf16.gmra.mrb[4].mxu0 %vm330_vm0, %v1000_v12  ;;  %958 = vmatmul.mubr.msk.bf16.gmra.mrb[4].mxu1 %vm330_vm0, %v1001_v13 }
  0x23   : > { %945 = vmatprep.mubr.msk.bf16.mxu0 %vm330_vm0, %v1002_v14  ;;  %961 = vmatprep.mubr.msk.bf16.mxu1 %vm330_vm0, %v1003_v15 }
  0x2a   : > { %946 = vmatmul.mubr.msk.bf16.gmra.mrb[8].mxu0 %vm330_vm0, %v1004_v16  ;;  %962 = vmatmul.mubr.msk.bf16.gmra.mrb[8].mxu1 %vm330_vm0, %v1005_v17 }
  0x2b   : > { %949 = vmatprep.mubr.msk.bf16.mxu0 %vm330_vm0, %v1006_v18  ;;  %965 = vmatprep.mubr.msk.bf16.mxu1 %vm330_vm0, %v1007_v19 }
  0x32   : > { %950 = vmatmul.mubr.msk.bf16.gmra.mrb[12].mxu0 %vm330_vm0, %v1008_v20  ;;  %966 = vmatmul.mubr.msk.bf16.gmra.mrb[12].mxu1 %vm330_vm0, %v1009_v21 }
  0xed   : > { %v939_v23 = vpop.f32.mrb[0].mxu0  ;;  %v955_v24 = vpop.f32.mrb[0].mxu1 }
  0xee   : > { %v426_v25 = vadd.f32 %v939_v23, %v1106_v22  ;;  %v490_v26 = vadd.f32 %v955_v24, %v1106_v22  ;;  %v417_v27 = vpop.f32.mrb[1].mxu0  ;;  %v481_v28 = vpop.f32.mrb[1].mxu1 }
  0xef   : > { %v418_v29 = vadd.f32 %v1106_v22, %v417_v27  ;;  %v482_v30 = vadd.f32 %v1106_v22, %v481_v28  ;;  %v940_v31 = vpop.f32.mrb[2].mxu0  ;;  %v956_v32 = vpop.f32.mrb[2].mxu1 }
  0xf0   : > { %v546_v33 = vmax.f32 %v426_v25, 0.0  ;;  %v562_v34 = vmax.f32 %v490_v26, 0.0  ;;  %v429_v35 = vadd.f32 %v940_v31, %v1106_v22  ;;  %v493_v36 = vadd.f32 %v956_v32, %v1106_v22  ;;  %v420_v37 = vpop.f32.mrb[3].mxu0  ;;  %v484_v38 = vpop.f32.mrb[3].mxu1 }
  0xf1   : > { %v544_v39 = vmax.f32 %v418_v29, 0.0  ;;  %v560_v40 = vmax.f32 %v482_v30, 0.0  ;;  %v421_v41 = vadd.f32 %v1106_v22, %v420_v37  ;;  %v485_v42 = vadd.f32 %v1106_v22, %v484_v38 }
  0xf2   : > { %v876_v43 = vpack.c.bf16 %v546_v33, %v546_v33  ;;  %v892_v44 = vpack.c.bf16 %v562_v34, %v562_v34  ;;  %v547_v45 = vmax.f32 %v429_v35, 0.0  ;;  %v563_v46 = vmax.f32 %v493_v36, 0.0 }
  0xf3   : > { %v874_v47 = vpack.c.bf16 %v544_v39, %v544_v39  ;;  %v890_v48 = vpack.c.bf16 %v560_v40, %v560_v40  ;;  %v545_v49 = vmax.f32 %v421_v41, 0.0  ;;  %v561_v50 = vmax.f32 %v485_v42, 0.0 }
  0xf4   : > { %707 = vst.msk [vmem:[%s1119_s6 + $0x8] sm:$0xf] %vm704_vm2, %v876_v43  ;;  %723 = vst.msk [vmem:[%s1119_s6 + $0x48] sm:$0xf] %vm704_vm2, %v892_v44  ;;  %v877_v51 = vpack.c.bf16 %v547_v45, %v547_v45  ;;  %v893_v52 = vpack.c.bf16 %v563_v46, %v563_v46 }
  0xf5   : > { %705 = vst.msk [vmem:[%s1119_s6] sm:$0xf] %vm704_vm2, %v874_v47  ;;  %721 = vst.msk [vmem:[%s1119_s6 + $0x40] sm:$0xf] %vm704_vm2, %v890_v48  ;;  %v875_v53 = vpack.c.bf16 %v545_v49, %v545_v49  ;;  %v891_v54 = vpack.c.bf16 %v561_v50, %v561_v50  ;;  %v943_v55 = vpop.f32.mrb[4].mxu0  ;;  %v959_v56 = vpop.f32.mrb[4].mxu1 }
  0xf6   : > { %708 = vst.msk [vmem:[%s1119_s6 + $0xc] sm:$0xf] %vm704_vm2, %v877_v51  ;;  %724 = vst.msk [vmem:[%s1119_s6 + $0x4c] sm:$0xf] %vm704_vm2, %v893_v52  ;;  %v442_v57 = vadd.f32 %v943_v55, %v1106_v22  ;;  %v506_v58 = vadd.f32 %v959_v56, %v1106_v22  ;;  %v433_v59 = vpop.f32.mrb[5].mxu0  ;;  %v497_v60 = vpop.f32.mrb[5].mxu1 }
  0xf7   : > { %706 = vst.msk [vmem:[%s1119_s6 + $0x4] sm:$0xf] %vm704_vm2, %v875_v53  ;;  %722 = vst.msk [vmem:[%s1119_s6 + $0x44] sm:$0xf] %vm704_vm2, %v891_v54  ;;  %v434_v61 = vadd.f32 %v1106_v22, %v433_v59  ;;  %v498_v62 = vadd.f32 %v1106_v22, %v497_v60  ;;  %v944_v63 = vpop.f32.mrb[6].mxu0  ;;  %v960_v0 = vpop.f32.mrb[6].mxu1 }
  0xf8   : > { %v550_v1 = vmax.f32 %v442_v57, 0.0  ;;  %v566_v2 = vmax.f32 %v506_v58, 0.0  ;;  %v445_v3 = vadd.f32 %v944_v63, %v1106_v22  ;;  %v509_v4 = vadd.f32 %v960_v0, %v1106_v22  ;;  %v436_v5 = vpop.f32.mrb[7].mxu0  ;;  %v500_v6 = vpop.f32.mrb[7].mxu1 }
  0xf9   : > { %v548_v7 = vmax.f32 %v434_v61, 0.0  ;;  %v564_v8 = vmax.f32 %v498_v62, 0.0  ;;  %v437_v9 = vadd.f32 %v1106_v22, %v436_v5  ;;  %v501_v10 = vadd.f32 %v1106_v22, %v500_v6 }
  0xfa   : > { %v880_v11 = vpack.c.bf16 %v550_v1, %v550_v1  ;;  %v896_v12 = vpack.c.bf16 %v566_v2, %v566_v2  ;;  %v551_v13 = vmax.f32 %v445_v3, 0.0  ;;  %v567_v14 = vmax.f32 %v509_v4, 0.0 }
  0xfb   : > { %v878_v15 = vpack.c.bf16 %v548_v7, %v548_v7  ;;  %v894_v16 = vpack.c.bf16 %v564_v8, %v564_v8  ;;  %v549_v17 = vmax.f32 %v437_v9, 0.0  ;;  %v565_v18 = vmax.f32 %v501_v10, 0.0 }
  0xfc   : > { %711 = vst.msk [vmem:[%s1119_s6 + $0x18] sm:$0xf] %vm704_vm2, %v880_v11  ;;  %727 = vst.msk [vmem:[%s1119_s6 + $0x58] sm:$0xf] %vm704_vm2, %v896_v12  ;;  %v881_v19 = vpack.c.bf16 %v551_v13, %v551_v13  ;;  %v897_v20 = vpack.c.bf16 %v567_v14, %v567_v14 }
  0xfd   : > { %709 = vst.msk [vmem:[%s1119_s6 + $0x10] sm:$0xf] %vm704_vm2, %v878_v15  ;;  %725 = vst.msk [vmem:[%s1119_s6 + $0x50] sm:$0xf] %vm704_vm2, %v894_v16  ;;  %v879_v21 = vpack.c.bf16 %v549_v17, %v549_v17  ;;  %v895_v23 = vpack.c.bf16 %v565_v18, %v565_v18  ;;  %v947_v24 = vpop.f32.mrb[8].mxu0  ;;  %v963_v25 = vpop.f32.mrb[8].mxu1 }
  0xfe   : > { %712 = vst.msk [vmem:[%s1119_s6 + $0x1c] sm:$0xf] %vm704_vm2, %v881_v19  ;;  %728 = vst.msk [vmem:[%s1119_s6 + $0x5c] sm:$0xf] %vm704_vm2, %v897_v20  ;;  %v458_v26 = vadd.f32 %v947_v24, %v1106_v22  ;;  %v522_v27 = vadd.f32 %v963_v25, %v1106_v22  ;;  %v449_v28 = vpop.f32.mrb[9].mxu0  ;;  %v513_v29 = vpop.f32.mrb[9].mxu1 }
  0xff   : > { %710 = vst.msk [vmem:[%s1119_s6 + $0x14] sm:$0xf] %vm704_vm2, %v879_v21  ;;  %726 = vst.msk [vmem:[%s1119_s6 + $0x54] sm:$0xf] %vm704_vm2, %v895_v23  ;;  %v450_v30 = vadd.f32 %v1106_v22, %v449_v28  ;;  %v514_v31 = vadd.f32 %v1106_v22, %v513_v29  ;;  %v948_v32 = vpop.f32.mrb[10].mxu0  ;;  %v964_v33 = vpop.f32.mrb[10].mxu1 }
 0x100   : > { %v554_v34 = vmax.f32 %v458_v26, 0.0  ;;  %v570_v35 = vmax.f32 %v522_v27, 0.0  ;;  %v461_v36 = vadd.f32 %v948_v32, %v1106_v22  ;;  %v525_v37 = vadd.f32 %v964_v33, %v1106_v22  ;;  %v452_v38 = vpop.f32.mrb[11].mxu0  ;;  %v516_v39 = vpop.f32.mrb[11].mxu1 }
 0x101   : > { %v552_v40 = vmax.f32 %v450_v30, 0.0  ;;  %v568_v41 = vmax.f32 %v514_v31, 0.0  ;;  %v453_v42 = vadd.f32 %v1106_v22, %v452_v38  ;;  %v517_v43 = vadd.f32 %v1106_v22, %v516_v39 }
 0x102   : > { %v884_v44 = vpack.c.bf16 %v554_v34, %v554_v34  ;;  %v900_v45 = vpack.c.bf16 %v570_v35, %v570_v35  ;;  %v555_v46 = vmax.f32 %v461_v36, 0.0  ;;  %v571_v47 = vmax.f32 %v525_v37, 0.0 }
 0x103   : > { %v882_v48 = vpack.c.bf16 %v552_v40, %v552_v40  ;;  %v898_v49 = vpack.c.bf16 %v568_v41, %v568_v41  ;;  %v553_v50 = vmax.f32 %v453_v42, 0.0  ;;  %v569_v51 = vmax.f32 %v517_v43, 0.0 }
 0x104   : > { %715 = vst.msk [vmem:[%s1119_s6 + $0x28] sm:$0xf] %vm704_vm2, %v884_v44  ;;  %731 = vst.msk [vmem:[%s1119_s6 + $0x68] sm:$0xf] %vm704_vm2, %v900_v45  ;;  %v885_v52 = vpack.c.bf16 %v555_v46, %v555_v46  ;;  %v901_v53 = vpack.c.bf16 %v571_v47, %v571_v47 }
 0x105   : > { %713 = vst.msk [vmem:[%s1119_s6 + $0x20] sm:$0xf] %vm704_vm2, %v882_v48  ;;  %729 = vst.msk [vmem:[%s1119_s6 + $0x60] sm:$0xf] %vm704_vm2, %v898_v49  ;;  %v883_v54 = vpack.c.bf16 %v553_v50, %v553_v50  ;;  %v899_v55 = vpack.c.bf16 %v569_v51, %v569_v51  ;;  %v951_v56 = vpop.f32.mrb[12].mxu0  ;;  %v967_v57 = vpop.f32.mrb[12].mxu1 }
 0x106   : > { %716 = vst.msk [vmem:[%s1119_s6 + $0x2c] sm:$0xf] %vm704_vm2, %v885_v52  ;;  %732 = vst.msk [vmem:[%s1119_s6 + $0x6c] sm:$0xf] %vm704_vm2, %v901_v53  ;;  %v474_v58 = vadd.f32 %v951_v56, %v1106_v22  ;;  %v538_v59 = vadd.f32 %v967_v57, %v1106_v22  ;;  %v465_v60 = vpop.f32.mrb[13].mxu0  ;;  %v529_v61 = vpop.f32.mrb[13].mxu1 }
 0x107   : > { %714 = vst.msk [vmem:[%s1119_s6 + $0x24] sm:$0xf] %vm704_vm2, %v883_v54  ;;  %730 = vst.msk [vmem:[%s1119_s6 + $0x64] sm:$0xf] %vm704_vm2, %v899_v55  ;;  %v466_v62 = vadd.f32 %v1106_v22, %v465_v60  ;;  %v530_v63 = vadd.f32 %v1106_v22, %v529_v61  ;;  %v952_v0 = vpop.f32.mrb[14].mxu0  ;;  %v968_v1 = vpop.f32.mrb[14].mxu1 }
 0x108   : > { %v558_v2 = vmax.f32 %v474_v58, 0.0  ;;  %v574_v3 = vmax.f32 %v538_v59, 0.0  ;;  %v477_v4 = vadd.f32 %v952_v0, %v1106_v22  ;;  %v541_v5 = vadd.f32 %v968_v1, %v1106_v22  ;;  %v468_v6 = vpop.f32.mrb[15].mxu0  ;;  %v532_v7 = vpop.f32.mrb[15].mxu1 }
 0x109   : > { %v556_v8 = vmax.f32 %v466_v62, 0.0  ;;  %v572_v9 = vmax.f32 %v530_v63, 0.0  ;;  %v469_v10 = vadd.f32 %v1106_v22, %v468_v6  ;;  %v533_v11 = vadd.f32 %v1106_v22, %v532_v7 }
 0x10a   : > { %v888_v12 = vpack.c.bf16 %v558_v2, %v558_v2  ;;  %v904_v13 = vpack.c.bf16 %v574_v3, %v574_v3  ;;  %v559_v14 = vmax.f32 %v477_v4, 0.0  ;;  %v575_v15 = vmax.f32 %v541_v5, 0.0 }
 0x10b   : > { %v886_v16 = vpack.c.bf16 %v556_v8, %v556_v8  ;;  %v902_v17 = vpack.c.bf16 %v572_v9, %v572_v9  ;;  %v557_v18 = vmax.f32 %v469_v10, 0.0  ;;  %v573_v19 = vmax.f32 %v533_v11, 0.0 }
 0x10c   : > { %719 = vst.msk [vmem:[%s1119_s6 + $0x38] sm:$0xf] %vm704_vm2, %v888_v12  ;;  %735 = vst.msk [vmem:[%s1119_s6 + $0x78] sm:$0xf] %vm704_vm2, %v904_v13  ;;  %v889_v20 = vpack.c.bf16 %v559_v14, %v559_v14  ;;  %v905_v21 = vpack.c.bf16 %v575_v15, %v575_v15 }
 0x10d   : > { %717 = vst.msk [vmem:[%s1119_s6 + $0x30] sm:$0xf] %vm704_vm2, %v886_v16  ;;  %733 = vst.msk [vmem:[%s1119_s6 + $0x70] sm:$0xf] %vm704_vm2, %v902_v17  ;;  %v887_v22 = vpack.c.bf16 %v557_v18, %v557_v18  ;;  %v903_v23 = vpack.c.bf16 %v573_v19, %v573_v19 }
 0x10e   : > { %720 = vst.msk [vmem:[%s1119_s6 + $0x3c] sm:$0xf] %vm704_vm2, %v889_v20  ;;  %736 = vst.msk [vmem:[%s1119_s6 + $0x7c] sm:$0xf] %vm704_vm2, %v905_v21 }
 0x10f   : > { %718 = vst.msk [vmem:[%s1119_s6 + $0x34] sm:$0xf] %vm704_vm2, %v887_v22  ;;  %734 = vst.msk [vmem:[%s1119_s6 + $0x74] sm:$0xf] %vm704_vm2, %v903_v23 }
 0x110 PF: > { %s13_s12 = sadd.s32 1, %s1016_s12  }
 0x111   : > { %p10_p4 = scmp.ge.s32.totalorder %s13_s12, 4  }
 0x113   :  { %12 = sbr.rel (!%p10_p4) target bundleno = 1 (0x1), region = 62 }

// kernel: vae_forward.13
= control target key start
LH: loop header
LB: loop body
LE: loop exit
PB: predicated region body
PF: predicated region fallthrough
CT: control target
= control target key end

     0   :  { %s1166_s12 = smov 0   ;;  %s1366_s0 = inlined_call_operand.vmem [shape: bf16[512,72], index: 0, kind: input, shape index: {}]   ;;  %s1367_s1 = inlined_call_operand.vmem [shape: bf16[72,4], index: 1, kind: input, shape index: {}]   ;;  %s1368_s2 = inlined_call_operand.vmem [shape: f32[1,4], index: 2, kind: input, shape index: {}]   ;;  %s1369_s3 = inlined_call_operand.vmem [shape: f32[512,4], index: 3, kind: output, shape index: {}]  }
   0x1 LB: > { %s825_s13 = sadd.s32 4294967295, %s1144_s12   ;;  %p829_p0 = scmp.ge.s32.totalorder %s1144_s12, 1  ;;  %s1144_s12 = sphi %s1166_s12, %s13_s12  }
   0x2   : > { %p138_p1 = scmp.lt.s32.totalorder %s1144_s12, 3 }
   0x4   : > { %p139_p2 = pnand %p829_p0, %p138_p1 }
   0x5   : > { %v989_v0 = vld [vmem:[%s1367_s1] sm:$0xff] (!%p139_p2)   ;;  %v990_v1 = vld [vmem:[%s1367_s1 + $0x8] sm:$0xff] (!%p139_p2)   ;;  %s830_s18 = sshll.u32 (!%p139_p2), %s825_s13, 5  ;;  %v991_v2 = vld [vmem:[%s1367_s1 + $0x10] sm:$0xff] (!%p139_p2)   ;;  %vm330_vm0 = vcmask (!%p139_p2), 588800   ;;  %vm379_vm1 = vcmask (!%p139_p2), 1043456  }
   0x6   : > { %142 = sbr.rel (%p139_p2) target bundleno = 326 (0x146), region = 32  ;;  %927 = vmatprep.subr.bf16.mxu0 (!%p139_p2), %v989_v0  ;;  %969 = vmatprep.subr.bf16.mxu1 (!%p139_p2), %v989_v0  ;;  %p163_p3 = scmp.lt.s32.totalorder (!%p139_p2), %s830_s18, 63  ;;  %v992_v3 = vld [vmem:[%s1367_s1 + $0x18] sm:$0xff] (!%p139_p2)   ;;  %v993_v6 = vld [vmem:[%s1367_s1 + $0x20] ss:$0 sps:$4 sm:$0xff] (!%p139_p2)   ;;  %vm736_vm2 = vcmask (!%p139_p2), 31744  }
   0x7   : > { %928 = vmatpush3.bf16.msra.mxu0 (!%p139_p2), %v989_v0  ;;  %974 = vmatpush3.bf16.msra.mxu1 (!%p139_p2), %v989_v0  ;;  %v381_v7 = vsel (!%p139_p2), %vm379_vm1, %v993_v6, 0  ;;  %v1232_v22 = vld [vmem:[%s1368_s2] ss:$0 sm:$0xff] (!%p139_p2) }
   0x8   : > { %929 = vmatprep.subr.bf16.mxu0 (!%p139_p2), %v990_v1  ;;  %970 = vmatprep.subr.bf16.mxu1 (!%p139_p2), %v990_v1 }
   0xb   : > { %930 = vmatpush3.bf16.msra.mxu0 (!%p139_p2), %v990_v1  ;;  %975 = vmatpush3.bf16.msra.mxu1 (!%p139_p2), %v990_v1 }
   0xc   : > { %931 = vmatprep.subr.bf16.mxu0 (!%p139_p2), %v991_v2  ;;  %971 = vmatprep.subr.bf16.mxu1 (!%p139_p2), %v991_v2 }
   0xd   : > { %s1371_s18 = smov (!%p163_p3, %s830_s18), 63 }
   0xe   : > { %s831_s21 = sshll.u32 %s1371_s18, 2  ;;  %s833_s4 = sshll.u32 %s1371_s18, 3 }
   0xf   : > { %s1192_s26 = scalar_lea.vmem %s1366_s0, %s831_s21  ;;  %932 = vmatpush3.bf16.msra.mxu0 %v991_v2  ;;  %976 = vmatpush3.bf16.msra.mxu1 %v991_v2  ;;  %s1262_s7 = scalar_lea.vmem %s1369_s3, %s833_s4 }
  0x10   : > { %v994_v4 = vld [vmem:[%s1192_s26] sm:$0xff]   ;;  %933 = vmatprep.subr.bf16.mxu0 %v992_v3  ;;  %972 = vmatprep.subr.bf16.mxu1 %v992_v3  ;;  %v996_v8 = vld [vmem:[%s1192_s26 + $0x8] sm:$0xff]   ;;  %v998_v10 = vld [vmem:[%s1192_s26 + $0x10] sm:$0xff]  }
  0x11   : > { %v995_v5 = vld [vmem:[%s1192_s26 + $0x40] sm:$0xff]   ;;  %937 = vmatprep.mubr.msk.bf16.mxu0 %vm330_vm0, %v994_v4  ;;  %v997_v9 = vld [vmem:[%s1192_s26 + $0x48] sm:$0xff]   ;;  %v999_v11 = vld [vmem:[%s1192_s26 + $0x50] sm:$0xff]  }
  0x12   : > { %953 = vmatprep.mubr.msk.bf16.mxu1 %vm330_vm0, %v995_v5  ;;  %v1000_v12 = vld [vmem:[%s1192_s26 + $0x18] sm:$0xff]   ;;  %v1002_v14 = vld [vmem:[%s1192_s26 + $0x20] sm:$0xff]   ;;  %v1004_v16 = vld [vmem:[%s1192_s26 + $0x28] sm:$0xff]  }
  0x13   : > { %934 = vmatpush3.bf16.msra.mxu0 %v992_v3  ;;  %977 = vmatpush3.bf16.msra.mxu1 %v992_v3  ;;  %v1001_v13 = vld [vmem:[%s1192_s26 + $0x58] sm:$0xff]   ;;  %v1003_v15 = vld [vmem:[%s1192_s26 + $0x60] sm:$0xff]   ;;  %v1005_v17 = vld [vmem:[%s1192_s26 + $0x68] sm:$0xff]  }
  0x14   : > { %979 = vmatprep.subr.msk.bf16.mxu0 %vm379_vm1, %v993_v6  ;;  %980 = vmatprep.subr.msk.bf16.mxu1 %vm379_vm1, %v993_v6  ;;  %v1006_v18 = vld [vmem:[%s1192_s26 + $0x30] sm:$0xff]   ;;  %v1008_v20 = vld [vmem:[%s1192_s26 + $0x38] sm:$0xff]  }
  0x15   : > { %v1007_v19 = vld [vmem:[%s1192_s26 + $0x70] sm:$0xff]   ;;  %v1009_v21 = vld [vmem:[%s1192_s26 + $0x78] sm:$0xff]  }
  0x17   : > { %936 = vmatpush3.bf16.msra.mxu0 %v381_v7  ;;  %978 = vmatpush3.bf16.msra.mxu1 %v381_v7 }
  0x1a   : > { %938 = vmatmul.mubr.msk.bf16.vlgmr.msra.gmra.mrb[0].mxu0 %vm330_vm0, %v996_v8  ;;  %954 = vmatmul.mubr.msk.bf16.vlgmr.msra.gmra.mrb[0].mxu1 %vm330_vm0, %v997_v9 }
  0x1b   : > { %941 = vmatprep.mubr.msk.bf16.mxu0 %vm330_vm0, %v998_v10  ;;  %957 = vmatprep.mubr.msk.bf16.mxu1 %vm330_vm0, %v999_v11 }
  0x22   : > { %942 = vmatmul.mubr.msk.bf16.gmra.mrb[4].mxu0 %vm330_vm0, %v1000_v12  ;;  %958 = vmatmul.mubr.msk.bf16.gmra.mrb[4].mxu1 %vm330_vm0, %v1001_v13 }
  0x23   : > { %945 = vmatprep.mubr.msk.bf16.mxu0 %vm330_vm0, %v1002_v14  ;;  %961 = vmatprep.mubr.msk.bf16.mxu1 %vm330_vm0, %v1003_v15 }
  0x2a   : > { %946 = vmatmul.mubr.msk.bf16.gmra.mrb[8].mxu0 %vm330_vm0, %v1004_v16  ;;  %962 = vmatmul.mubr.msk.bf16.gmra.mrb[8].mxu1 %vm330_vm0, %v1005_v17 }
  0x2b   : > { %949 = vmatprep.mubr.msk.bf16.mxu0 %vm330_vm0, %v1006_v18  ;;  %965 = vmatprep.mubr.msk.bf16.mxu1 %vm330_vm0, %v1007_v19 }
  0x32   : > { %950 = vmatmul.mubr.msk.bf16.gmra.mrb[12].mxu0 %vm330_vm0, %v1008_v20  ;;  %966 = vmatmul.mubr.msk.bf16.gmra.mrb[12].mxu1 %vm330_vm0, %v1009_v21 }
  0xed   : > { %v939_v23 = vpop.f32.mrb[0].mxu0  ;;  %v955_v24 = vpop.f32.mrb[0].mxu1 }
  0xee   : > { %v426_v25 = vadd.f32 %v939_v23, %v1232_v22  ;;  %v490_v26 = vadd.f32 %v955_v24, %v1232_v22  ;;  %v417_v27 = vpop.f32.mrb[1].mxu0  ;;  %v481_v28 = vpop.f32.mrb[1].mxu1 }
  0xef   : > { %v418_v29 = vadd.f32 %v1232_v22, %v417_v27  ;;  %v482_v30 = vadd.f32 %v1232_v22, %v481_v28  ;;  %v940_v31 = vpop.f32.mrb[2].mxu0  ;;  %v956_v32 = vpop.f32.mrb[2].mxu1 }
  0xf0   : > { %v874_v33 = vmul.f32 -1.442695, %v426_v25  ;;  %v890_v34 = vmul.f32 -1.442695, %v490_v26  ;;  %v429_v35 = vadd.f32 %v940_v31, %v1232_v22  ;;  %v493_v36 = vadd.f32 %v956_v32, %v1232_v22  ;;  %v420_v37 = vpop.f32.mrb[3].mxu0  ;;  %v484_v38 = vpop.f32.mrb[3].mxu1 }
  0xf1   : > { %v872_v39 = vmul.f32 -1.442695, %v418_v29  ;;  %v888_v40 = vmul.f32 -1.442695, %v482_v30  ;;  %v421_v41 = vadd.f32 %v1232_v22, %v420_v37  ;;  %v485_v42 = vadd.f32 %v1232_v22, %v484_v38 }
  0xf2   : > { %1010 = vpow2.f32 %v874_v33  ;;  %v875_v43 = vmul.f32 -1.442695, %v429_v35  ;;  %v891_v44 = vmul.f32 -1.442695, %v493_v36 }
  0xf3   : > { %1012 = vpow2.f32 %v890_v34  ;;  %v873_v45 = vmul.f32 -1.442695, %v421_v41  ;;  %v889_v46 = vmul.f32 -1.442695, %v485_v42 }
  0xf4   : > { %1014 = vpow2.f32 %v872_v39 }
  0xf5   : > { %1016 = vpow2.f32 %v888_v40  ;;  %v943_v47 = vpop.f32.mrb[4].mxu0  ;;  %v959_v48 = vpop.f32.mrb[4].mxu1 }
  0xf6   : > { %1018 = vpow2.f32 %v875_v43  ;;  %v442_v49 = vadd.f32 %v943_v47, %v1232_v22  ;;  %v506_v50 = vadd.f32 %v959_v48, %v1232_v22  ;;  %v433_v51 = vpop.f32.mrb[5].mxu0  ;;  %v497_v52 = vpop.f32.mrb[5].mxu1 }
  0xf7   : > { %1020 = vpow2.f32 %v891_v44  ;;  %v434_v53 = vadd.f32 %v1232_v22, %v433_v51  ;;  %v498_v54 = vadd.f32 %v1232_v22, %v497_v52  ;;  %v944_v55 = vpop.f32.mrb[6].mxu0  ;;  %v960_v56 = vpop.f32.mrb[6].mxu1 }
  0xf8   : > { %1022 = vpow2.f32 %v873_v45  ;;  %v878_v57 = vmul.f32 -1.442695, %v442_v49  ;;  %v894_v58 = vmul.f32 -1.442695, %v506_v50  ;;  %v445_v59 = vadd.f32 %v944_v55, %v1232_v22  ;;  %v436_v60 = vpop.f32.mrb[7].mxu0  ;;  %v500_v61 = vpop.f32.mrb[7].mxu1 }
  0xf9   : > { %1024 = vpow2.f32 %v889_v46  ;;  %v876_v62 = vmul.f32 -1.442695, %v434_v53  ;;  %v892_v63 = vmul.f32 -1.442695, %v498_v54  ;;  %v509_v27 = vadd.f32 %v960_v56, %v1232_v22 }
  0xfa   : > { %1026 = vpow2.f32 %v878_v57  ;;  %v879_v0 = vmul.f32 -1.442695, %v445_v59  ;;  %v437_v30 = vadd.f32 %v1232_v22, %v436_v60  ;;  %v501_v34 = vadd.f32 %v1232_v22, %v500_v61 }
  0xfb   : > { %1028 = vpow2.f32 %v894_v58  ;;  %v895_v44 = vmul.f32 -1.442695, %v509_v27 }
  0xfc   : > { %v1011_v1 = vpop.eup %1010  ;;  %1030 = vpow2.f32 %v876_v62  ;;  %v877_v50 = vmul.f32 -1.442695, %v437_v30  ;;  %v893_v54 = vmul.f32 -1.442695, %v501_v34 }
  0xfd   : > { %v1013_v2 = vpop.eup %1012  ;;  %v642_v3 = vadd.f32 1.0, %v1011_v1  ;;  %1032 = vpow2.f32 %v892_v63  ;;  %v947_v4 = vpop.f32.mrb[8].mxu0 }
  0xfe   : > { %v963_v5 = vpop.f32.mrb[8].mxu1  ;;  %v1015_v6 = vpop.eup %1014  ;;  %v658_v7 = vadd.f32 1.0, %v1013_v2  ;;  %1034 = vpow2.f32 %v879_v0  ;;  %v458_v39 = vadd.f32 %v947_v4, %v1232_v22 }
  0xff   : > { %v449_v8 = vpop.f32.mrb[9].mxu0  ;;  %v513_v9 = vpop.f32.mrb[9].mxu1  ;;  %1036 = vrcp.f32 %v642_v3  ;;  %v640_v11 = vadd.f32 1.0, %v1015_v6  ;;  %v522_v45 = vadd.f32 %v963_v5, %v1232_v22 }
 0x100   : > { %v1017_v10 = vpop.eup %1016  ;;  %v948_v12 = vpop.f32.mrb[10].mxu0  ;;  %1038 = vrcp.f32 %v658_v7  ;;  %v450_v51 = vadd.f32 %v1232_v22, %v449_v8  ;;  %v514_v55 = vadd.f32 %v1232_v22, %v513_v9  ;;  %v882_v57 = vmul.f32 -1.442695, %v458_v39 }
 0x101   : > { %v1247_v13 = vpop.f32.mrb[10].mxu1  ;;  %v1019_v14 = vpop.eup %1018  ;;  %v656_v15 = vadd.f32 1.0, %v1017_v10  ;;  %1040 = vrcp.f32 %v640_v11  ;;  %v461_v58 = vadd.f32 %v948_v12, %v1232_v22  ;;  %v898_v60 = vmul.f32 -1.442695, %v522_v45 }
 0x102   : > { %v1249_v16 = vpop.f32.mrb[11].mxu0  ;;  %v1021_v17 = vpop.eup %1020  ;;  %v643_v18 = vadd.f32 1.0, %v1019_v14  ;;  %v525_v61 = vadd.f32 %v1247_v13, %v1232_v22  ;;  %v880_v63 = vmul.f32 -1.442695, %v450_v51  ;;  %v896_v2 = vmul.f32 -1.442695, %v514_v55 }
 0x103   : > { %v1251_v19 = vpop.f32.mrb[11].mxu1  ;;  %v1023_v20 = vpop.eup %1022  ;;  %1042 = vrcp.f32 %v656_v15  ;;  %v659_v21 = vadd.f32 1.0, %v1021_v17  ;;  %v453_v0 = vadd.f32 %v1232_v22, %v1249_v16  ;;  %v883_v5 = vmul.f32 -1.442695, %v461_v58 }
 0x104   : > { %v1025_v23 = vpop.eup %1024  ;;  %1044 = vrcp.f32 %v643_v18  ;;  %v641_v24 = vadd.f32 1.0, %v1023_v20  ;;  %v517_v3 = vadd.f32 %v1232_v22, %v1251_v19  ;;  %v899_v8 = vmul.f32 -1.442695, %v525_v61 }
 0x105   : > { %v1027_v25 = vpop.eup %1026  ;;  %1046 = vrcp.f32 %v659_v21  ;;  %v657_v26 = vadd.f32 1.0, %v1025_v23  ;;  %v951_v31 = vpop.f32.mrb[12].mxu0  ;;  %v881_v11 = vmul.f32 -1.442695, %v453_v0 }
 0x106   : > { %v1029_v28 = vpop.eup %1028  ;;  %1048 = vrcp.f32 %v641_v24  ;;  %v646_v29 = vadd.f32 1.0, %v1027_v25  ;;  %v967_v35 = vpop.f32.mrb[12].mxu1  ;;  %v474_v6 = vadd.f32 %v951_v31, %v1232_v22  ;;  %v897_v13 = vmul.f32 -1.442695, %v517_v3 }
 0x107   : > { %v1031_v32 = vpop.eup %1030  ;;  %1050 = vrcp.f32 %v657_v26  ;;  %v662_v33 = vadd.f32 1.0, %v1029_v28  ;;  %v1257_v36 = vpop.f32.mrb[13].mxu0  ;;  %v538_v9 = vadd.f32 %v967_v35, %v1232_v22 }
 0x108   : > { %v1033_v37 = vpop.eup %1032  ;;  %1052 = vrcp.f32 %v646_v29  ;;  %v644_v38 = vadd.f32 1.0, %v1031_v32  ;;  %v1265_v40 = vpop.f32.mrb[13].mxu1  ;;  %v886_v15 = vmul.f32 -1.442695, %v474_v6 }
 0x109   : > { %v1267_v41 = vpop.f32.mrb[14].mxu0  ;;  %v1035_v42 = vpop.eup %1034  ;;  %1054 = vrcp.f32 %v662_v33  ;;  %v660_v43 = vadd.f32 1.0, %v1033_v37  ;;  %v902_v17 = vmul.f32 -1.442695, %v538_v9 }
 0x10a   : > { %v1270_v46 = vpop.f32.mrb[14].mxu1  ;;  %v1272_v47 = vpop.f32.mrb[15].mxu0  ;;  %1056 = vrcp.f32 %v644_v38  ;;  %v647_v49 = vadd.f32 1.0, %v1035_v42  ;;  %v466_v38 = vadd.f32 %v1232_v22, %v1257_v36 }
 0x10b   : > { %v1037_v48 = vpop.eup %1036  ;;  %v1275_v52 = vpop.f32.mrb[15].mxu1  ;;  %1058 = vrcp.f32 %v660_v43  ;;  %v530_v43 = vadd.f32 %v1232_v22, %v1265_v40  ;;  %v541_v51 = vadd.f32 %v1270_v46, %v1232_v22  ;;  %v469_v40 = vadd.f32 %v1232_v22, %v1272_v47 }
 0x10c   : > { %v1039_v53 = vpop.eup %1038  ;;  %739 = vst.msk [vmem:[%s1262_s7 + $0x10] sm:$0xff] %vm736_vm2, %v1037_v48  ;;  %1060 = vrcp.f32 %v647_v49  ;;  %v477_v48 = vadd.f32 %v1267_v41, %v1232_v22 }
 0x10d   : > { %v1041_v56 = vpop.eup %1040  ;;  %755 = vst.msk [vmem:[%s1262_s7 + $0x90] sm:$0xff] %vm736_vm2, %v1039_v53  ;;  %1062 = vpow2.f32 %v895_v44  ;;  %v900_v41 = vmul.f32 -1.442695, %v530_v43  ;;  %v903_v47 = vmul.f32 -1.442695, %v541_v51 }
 0x10e   : > { %v1043_v59 = vpop.eup %1042  ;;  %737 = vst.msk [vmem:[%s1262_s7] sm:$0xff] %vm736_vm2, %v1041_v56  ;;  %1064 = vpow2.f32 %v877_v50  ;;  %v887_v46 = vmul.f32 -1.442695, %v477_v48  ;;  %v885_v61 = vmul.f32 -1.442695, %v469_v40 }
 0x10f   : > { %v1045_v62 = vpop.eup %1044  ;;  %753 = vst.msk [vmem:[%s1262_s7 + $0x80] sm:$0xff] %vm736_vm2, %v1043_v59  ;;  %1066 = vpow2.f32 %v893_v54  ;;  %v884_v54 = vmul.f32 -1.442695, %v466_v38 }
 0x110   : > { %v1047_v1 = vpop.eup %1046  ;;  %740 = vst.msk [vmem:[%s1262_s7 + $0x18] sm:$0xff] %vm736_vm2, %v1045_v62  ;;  %1068 = vpow2.f32 %v882_v57  ;;  %v533_v57 = vadd.f32 %v1232_v22, %v1275_v52 }
 0x111   : > { %v1049_v4 = vpop.eup %1048  ;;  %756 = vst.msk [vmem:[%s1262_s7 + $0x98] sm:$0xff] %vm736_vm2, %v1047_v1  ;;  %1070 = vpow2.f32 %v898_v60 }
 0x112   : > { %v1051_v7 = vpop.eup %1050  ;;  %738 = vst.msk [vmem:[%s1262_s7 + $0x8] sm:$0xff] %vm736_vm2, %v1049_v4  ;;  %1072 = vpow2.f32 %v880_v63  ;;  %v901_v52 = vmul.f32 -1.442695, %v533_v57 }
 0x113   : > { %v1053_v10 = vpop.eup %1052  ;;  %754 = vst.msk [vmem:[%s1262_s7 + $0x88] sm:$0xff] %vm736_vm2, %v1051_v7  ;;  %1074 = vpow2.f32 %v896_v2 }
 0x114   : > { %v1055_v12 = vpop.eup %1054  ;;  %743 = vst.msk [vmem:[%s1262_s7 + $0x30] sm:$0xff] %vm736_vm2, %v1053_v10  ;;  %1076 = vpow2.f32 %v883_v5 }
 0x115   : > { %v1057_v14 = vpop.eup %1056  ;;  %759 = vst.msk [vmem:[%s1262_s7 + $0xb0] sm:$0xff] %vm736_vm2, %v1055_v12  ;;  %1078 = vpow2.f32 %v899_v8 }
 0x116   : > { %v1059_v16 = vpop.eup %1058  ;;  %741 = vst.msk [vmem:[%s1262_s7 + $0x20] sm:$0xff] %vm736_vm2, %v1057_v14  ;;  %1080 = vpow2.f32 %v881_v11 }
 0x117   : > { %v1061_v18 = vpop.eup %1060  ;;  %757 = vst.msk [vmem:[%s1262_s7 + $0xa0] sm:$0xff] %vm736_vm2, %v1059_v16  ;;  %1082 = vpow2.f32 %v897_v13 }
 0x118   : > { %v1063_v19 = vpop.eup %1062  ;;  %744 = vst.msk [vmem:[%s1262_s7 + $0x38] sm:$0xff] %vm736_vm2, %v1061_v18  ;;  %1084 = vpow2.f32 %v886_v15 }
 0x119   : > { %v1065_v20 = vpop.eup %1064  ;;  %v663_v21 = vadd.f32 1.0, %v1063_v19  ;;  %1086 = vpow2.f32 %v902_v17 }
 0x11a   : > { %v1067_v23 = vpop.eup %1066  ;;  %v645_v24 = vadd.f32 1.0, %v1065_v20 }
 0x11b   : > { %v1069_v25 = vpop.eup %1068  ;;  %1088 = vrcp.f32 %v663_v21  ;;  %v661_v26 = vadd.f32 1.0, %v1067_v23 }
 0x11c   : > { %v1071_v27 = vpop.eup %1070  ;;  %1090 = vrcp.f32 %v645_v24  ;;  %v650_v28 = vadd.f32 1.0, %v1069_v25 }
 0x11d   : > { %v1073_v29 = vpop.eup %1072  ;;  %1092 = vrcp.f32 %v661_v26  ;;  %v666_v30 = vadd.f32 1.0, %v1071_v27 }
 0x11e   : > { %v1075_v31 = vpop.eup %1074  ;;  %1094 = vrcp.f32 %v650_v28  ;;  %v648_v32 = vadd.f32 1.0, %v1073_v29 }
 0x11f   : > { %v1077_v33 = vpop.eup %1076  ;;  %1096 = vrcp.f32 %v666_v30  ;;  %v664_v34 = vadd.f32 1.0, %v1075_v31 }
 0x120   : > { %v1079_v35 = vpop.eup %1078  ;;  %1098 = vrcp.f32 %v648_v32  ;;  %v651_v37 = vadd.f32 1.0, %v1077_v33 }
 0x121   : > { %v1081_v39 = vpop.eup %1080  ;;  %1100 = vrcp.f32 %v664_v34  ;;  %v667_v42 = vadd.f32 1.0, %v1079_v35 }
 0x122   : > { %v1083_v44 = vpop.eup %1082  ;;  %1102 = vrcp.f32 %v651_v37  ;;  %v649_v45 = vadd.f32 1.0, %v1081_v39 }
 0x123   : > { %v1085_v49 = vpop.eup %1084  ;;  %1104 = vrcp.f32 %v667_v42  ;;  %v665_v50 = vadd.f32 1.0, %v1083_v44 }
 0x124   : > { %v1087_v36 = vpop.eup %1086  ;;  %1106 = vrcp.f32 %v649_v45  ;;  %v654_v53 = vadd.f32 1.0, %v1085_v49 }
 0x125   : > { %v1089_v55 = vpop.eup %1088  ;;  %1108 = vrcp.f32 %v665_v50  ;;  %v670_v56 = vadd.f32 1.0, %v1087_v36 }
 0x126   : > { %v1091_v58 = vpop.eup %1090  ;;  %760 = vst.msk [vmem:[%s1262_s7 + $0xb8] sm:$0xff] %vm736_vm2, %v1089_v55  ;;  %1110 = vrcp.f32 %v654_v53 }
 0x127   : > { %v1093_v59 = vpop.eup %1092  ;;  %742 = vst.msk [vmem:[%s1262_s7 + $0x28] sm:$0xff] %vm736_vm2, %v1091_v58  ;;  %1112 = vrcp.f32 %v670_v56 }
 0x128   : > { %v1095_v60 = vpop.eup %1094  ;;  %758 = vst.msk [vmem:[%s1262_s7 + $0xa8] sm:$0xff] %vm736_vm2, %v1093_v59  ;;  %1114 = vpow2.f32 %v884_v54 }
 0x129   : > { %v1097_v22 = vpop.eup %1096  ;;  %747 = vst.msk [vmem:[%s1262_s7 + $0x50] sm:$0xff] %vm736_vm2, %v1095_v60  ;;  %1116 = vpow2.f32 %v900_v41 }
 0x12a   : > { %v1099_v62 = vpop.eup %1098  ;;  %763 = vst.msk [vmem:[%s1262_s7 + $0xd0] sm:$0xff] %vm736_vm2, %v1097_v22  ;;  %1118 = vpow2.f32 %v887_v46 }
 0x12b   : > { %v1101_v63 = vpop.eup %1100  ;;  %745 = vst.msk [vmem:[%s1262_s7 + $0x40] sm:$0xff] %vm736_vm2, %v1099_v62  ;;  %1120 = vpow2.f32 %v903_v47 }
 0x12c   : > { %v1103_v0 = vpop.eup %1102  ;;  %761 = vst.msk [vmem:[%s1262_s7 + $0xc0] sm:$0xff] %vm736_vm2, %v1101_v63  ;;  %1122 = vpow2.f32 %v885_v61 }
 0x12d   : > { %v1105_v1 = vpop.eup %1104  ;;  %748 = vst.msk [vmem:[%s1262_s7 + $0x58] sm:$0xff] %vm736_vm2, %v1103_v0  ;;  %1124 = vpow2.f32 %v901_v52 }
 0x12e   : > { %v1107_v2 = vpop.eup %1106  ;;  %764 = vst.msk [vmem:[%s1262_s7 + $0xd8] sm:$0xff] %vm736_vm2, %v1105_v1 }
 0x12f   : > { %v1109_v3 = vpop.eup %1108  ;;  %746 = vst.msk [vmem:[%s1262_s7 + $0x48] sm:$0xff] %vm736_vm2, %v1107_v2 }
 0x130   : > { %v1111_v4 = vpop.eup %1110  ;;  %762 = vst.msk [vmem:[%s1262_s7 + $0xc8] sm:$0xff] %vm736_vm2, %v1109_v3 }
 0x131   : > { %v1113_v5 = vpop.eup %1112  ;;  %751 = vst.msk [vmem:[%s1262_s7 + $0x70] sm:$0xff] %vm736_vm2, %v1111_v4 }
 0x132   : > { %v1115_v6 = vpop.eup %1114  ;;  %767 = vst.msk [vmem:[%s1262_s7 + $0xf0] sm:$0xff] %vm736_vm2, %v1113_v5 }
 0x133   : > { %v1117_v7 = vpop.eup %1116  ;;  %v652_v8 = vadd.f32 1.0, %v1115_v6 }
 0x134   : > { %v1119_v9 = vpop.eup %1118  ;;  %v668_v10 = vadd.f32 1.0, %v1117_v7 }
 0x135   : > { %v1121_v11 = vpop.eup %1120  ;;  %1126 = vrcp.f32 %v652_v8  ;;  %v655_v12 = vadd.f32 1.0, %v1119_v9 }
 0x136   : > { %v1123_v13 = vpop.eup %1122  ;;  %1128 = vrcp.f32 %v668_v10  ;;  %v671_v14 = vadd.f32 1.0, %v1121_v11 }
 0x137   : > { %v1125_v15 = vpop.eup %1124  ;;  %1130 = vrcp.f32 %v655_v12  ;;  %v653_v16 = vadd.f32 1.0, %v1123_v13 }
 0x138   : > { %1132 = vrcp.f32 %v671_v14  ;;  %v669_v17 = vadd.f32 1.0, %v1125_v15 }
 0x139   : > { %1134 = vrcp.f32 %v653_v16 }
 0x13a   : > { %1136 = vrcp.f32 %v669_v17 }
 0x13f   : > { %v1127_v18 = vpop.eup %1126 }
 0x140   : > { %v1129_v19 = vpop.eup %1128  ;;  %749 = vst.msk [vmem:[%s1262_s7 + $0x60] sm:$0xff] %vm736_vm2, %v1127_v18 }
 0x141   : > { %v1131_v20 = vpop.eup %1130  ;;  %765 = vst.msk [vmem:[%s1262_s7 + $0xe0] sm:$0xff] %vm736_vm2, %v1129_v19 }
 0x142   : > { %v1133_v21 = vpop.eup %1132  ;;  %752 = vst.msk [vmem:[%s1262_s7 + $0x78] sm:$0xff] %vm736_vm2, %v1131_v20 }
 0x143   : > { %v1135_v23 = vpop.eup %1134  ;;  %768 = vst.msk [vmem:[%s1262_s7 + $0xf8] sm:$0xff] %vm736_vm2, %v1133_v21 }
 0x144   : > { %v1137_v24 = vpop.eup %1136  ;;  %750 = vst.msk [vmem:[%s1262_s7 + $0x68] sm:$0xff] %vm736_vm2, %v1135_v23 }
 0x145   : > { %766 = vst.msk [vmem:[%s1262_s7 + $0xe8] sm:$0xff] %vm736_vm2, %v1137_v24 }
 0x146 PF: > { %s13_s12 = sadd.s32 1, %s1144_s12  }
 0x147   : > { %p10_p4 = scmp.ge.s32.totalorder %s13_s12, 4  }
 0x149   :  { %12 = sbr.rel (!%p10_p4) target bundleno = 1 (0x1), region = 62 }

</bundles_post_ra>
